<compile_context>
chip_gen: v5e
topology: v5e:2x2
jax: 0.10.0
libtpu: 0.0.40
codegen_flags: <defaults>
</compile_context>

<pallas_src>
import functools

import jax
import jax.numpy as jnp
from jax import lax
from jax.experimental import pallas as pl
from jax.experimental.pallas import tpu as pltpu

INPUT_SIZE = 4
HIDDEN = 32
NUM_LAYERS = 4
FUSED_K = 2 * HIDDEN  # width of concat([x_pad, h])


def _round_up(n, m):
    return ((n + m - 1) // m) * m


def _rnn_chunk_kernel(x_ref, h0_ref, wf_ref, bf_ref, wout_ref, bout_ref,
                      out_ref, hN_ref, h_scr, *, seq_len, chunk_len):
    c = pl.program_id(0)

    # Load the initial hidden state into the persistent scratch on chunk 0.
    @pl.when(c == 0)
    def _():
        h_scr[...] = h0_ref[...]

    B = x_ref.shape[1]

    # Hoist all weight / bias loads (and broadcasts) out of the time loop.
    w = [wf_ref[l] for l in range(NUM_LAYERS)]                       # (2H, H)
    b = [jnp.broadcast_to(bf_ref[l], (B, HIDDEN)) for l in range(NUM_LAYERS)]
    wo = jnp.broadcast_to(wout_ref[...], (B, HIDDEN))                # (B, H)
    bo = jnp.broadcast_to(bout_ref[...], (B, 1))                     # (B, 1)

    col = lax.broadcasted_iota(jnp.int32, (B, chunk_len), 1)         # (B, TB)
    base = c * chunk_len

    def step(i, carry):
        hs = list(carry[:NUM_LAYERS])
        acc = carry[NUM_LAYERS]
        cur = x_ref[i]                                               # (B, 32)
        new = []
        for l in range(NUM_LAYERS):
            # Fused ih/hh matmul: one (B, 2H) @ (2H, H) MXU push per layer.
            cat = jnp.concatenate([cur, hs[l]], axis=-1)             # (B, 2H)
            hl = jnp.tanh(
                jnp.dot(cat, w[l], preferred_element_type=jnp.float32) + b[l])
            new.append(hl)
            cur = hl
        # Per-timestep Linear(32 -> 1) on VPU/XLU (no extra MXU push),
        # accumulated into a lane-dense (B, TB) register slab.
        y = jnp.sum(cur * wo, axis=-1, keepdims=True) + bo           # (B, 1)
        acc = jnp.where(col == i, y, acc)
        # Mask padded timesteps so the carried hidden state stays correct.
        valid = (base + i) < seq_len
        hs_out = tuple(jnp.where(valid, new[l], hs[l]) for l in range(NUM_LAYERS))
        return (*hs_out, acc)

    init = tuple(h_scr[l] for l in range(NUM_LAYERS)) + (
        jnp.zeros((B, chunk_len), jnp.float32),)
    carry = lax.fori_loop(0, chunk_len, step, init,
                          unroll=min(8, chunk_len))

    # One lane-dense store per chunk (TB lanes), instead of T masked (B,1) stores.
    out_ref[0] = carry[NUM_LAYERS]
    for l in range(NUM_LAYERS):
        h_scr[l] = carry[l]

    @pl.when(c == pl.num_programs(0) - 1)
    def _():
        for l in range(NUM_LAYERS):
            hN_ref[l] = carry[l]


@jax.jit
def radar_rnn2_forward(x_btI, h0, params):
    """x_btI: (B, T, INPUT_SIZE) float32 (PyTorch batch_first layout).
       h0:    (NUM_LAYERS, B, HIDDEN) float32.
       Returns (outs (B, T, 1), h_state (NUM_LAYERS, B, HIDDEN))."""
    B, T, I = x_btI.shape
    wih0, bih0, wih, bih, whh, bhh, wout, bout = params

    # Fuse per-layer input & recurrent weights:  [x_pad, h] @ [W_ih ; W_hh].
    wih0_pad = jnp.pad(wih0, ((0, HIDDEN - I), (0, 0)))              # (H, H)
    wih_all = jnp.concatenate([wih0_pad[None], wih], axis=0)         # (L, H, H)
    wf = jnp.concatenate([wih_all, whh], axis=1)                     # (L, 2H, H)
    bf = jnp.concatenate([bih0[None], bih], axis=0) + bhh            # (L, 1, H)
    wout_row = wout.T                                                # (1, H)

    chunk = min(128, _round_up(T, 8))            # timesteps per grid step
    num_chunks = -(-T // chunk)
    t_pad = num_chunks * chunk

    x_tbi = jnp.transpose(x_btI, (1, 0, 2))                          # (T, B, I)
    x_tbi = jnp.pad(x_tbi, ((0, t_pad - T), (0, 0), (0, HIDDEN - I)))

    kernel = functools.partial(_rnn_chunk_kernel, seq_len=T, chunk_len=chunk)

    out_cbt, h_state = pl.pallas_call(
        kernel,
        out_shape=(
            jax.ShapeDtypeStruct((num_chunks, B, chunk), jnp.float32),
            jax.ShapeDtypeStruct((NUM_LAYERS, B, HIDDEN), jnp.float32),
        ),
        grid_spec=pltpu.PrefetchScalarGridSpec(
            num_scalar_prefetch=0,
            grid=(num_chunks,),
            in_specs=[
                pl.BlockSpec((chunk, B, HIDDEN), lambda c: (c, 0, 0)),        # x chunk
                pl.BlockSpec((NUM_LAYERS, B, HIDDEN), lambda c: (0, 0, 0)),   # h0
                pl.BlockSpec((NUM_LAYERS, FUSED_K, HIDDEN), lambda c: (0, 0, 0)),  # fused W
                pl.BlockSpec((NUM_LAYERS, 1, HIDDEN), lambda c: (0, 0, 0)),   # fused b
                pl.BlockSpec((1, HIDDEN), lambda c: (0, 0)),                  # W_out row
                pl.BlockSpec((1, 1), lambda c: (0, 0)),                       # b_out
            ],
            out_specs=[
                pl.BlockSpec((1, B, chunk), lambda c: (c, 0, 0)),
                pl.BlockSpec((NUM_LAYERS, B, HIDDEN), lambda c: (0, 0, 0)),
            ],
            scratch_shapes=[pltpu.VMEM((NUM_LAYERS, B, HIDDEN), jnp.float32)],
        ),
        compiler_params=pltpu.CompilerParams(
            dimension_semantics=("arbitrary",)),  # sequential recurrence over time
    )(x_tbi, h0, wf, bf, wout_row, bout)

    outs = jnp.transpose(out_cbt, (1, 0, 2)).reshape(B, t_pad)[:, :T]
    return outs[..., None], h_state


def init_params(key):
    """Deterministic synthetic parameters matching nn.RNN(I, 32, 4) + Linear(32, 1)."""
    ks = jax.random.split(key, 10)
    scale = 1.0 / jnp.sqrt(jnp.float32(HIDDEN))
    u = lambda k, shape: jax.random.uniform(k, shape, jnp.float32, -scale, scale)
    # Stored pre-transposed so the math is  x @ W  (== x @ W_torch^T).
    wih0 = u(ks[0], (INPUT_SIZE, HIDDEN))
    bih0 = u(ks[1], (1, HIDDEN))
    wih = u(ks[2], (NUM_LAYERS - 1, HIDDEN, HIDDEN))
    bih = u(ks[3], (NUM_LAYERS - 1, 1, HIDDEN))
    whh = u(ks[4], (NUM_LAYERS, HIDDEN, HIDDEN))
    bhh = u(ks[5], (NUM_LAYERS, 1, HIDDEN))
    wout = u(ks[6], (HIDDEN, 1))
    bout = u(ks[7], (1, 1))
    return (wih0, bih0, wih, bih, whh, bhh, wout, bout)


def reference_forward(x_btI, h0, params):
    """Pure-JAX reference replicating torch nn.RNN (tanh) + Linear semantics.
    (Algebraically identical to the torch module; uses the fused [x,h] @ [Wih;Whh]
    formulation so it follows the same numerical path as the kernel.)"""
    wih0, bih0, wih, bih, whh, bhh, wout, bout = params
    B, T, I = x_btI.shape
    wih0_pad = jnp.pad(wih0, ((0, HIDDEN - I), (0, 0)))
    wih_all = jnp.concatenate([wih0_pad[None], wih], axis=0)
    wf = jnp.concatenate([wih_all, whh], axis=1)
    bf = jnp.concatenate([bih0[None], bih], axis=0) + bhh
    wout_row = wout.T
    x_pad = jnp.pad(x_btI, ((0, 0), (0, 0), (0, HIDDEN - I)))
    h = [h0[l] for l in range(NUM_LAYERS)]
    outs = []
    for t in range(T):
        cur = x_pad[:, t, :]
        for l in range(NUM_LAYERS):
            cat = jnp.concatenate([cur, h[l]], axis=-1)
            h[l] = jnp.tanh(cat @ wf[l] + bf[l])
            cur = h[l]
        outs.append(jnp.sum(cur * wout_row, axis=-1, keepdims=True) + bout)
    return jnp.stack(outs, axis=1), jnp.stack(h, axis=0)


if __name__ == "__main__":
    key = jax.random.PRNGKey(0)
    k_x, k_h, k_p = jax.random.split(key, 3)

    B, T = 2, 8
    x = jax.random.normal(k_x, (B, T, INPUT_SIZE), jnp.float32)
    h0 = jax.random.normal(k_h, (NUM_LAYERS, B, HIDDEN), jnp.float32)
    params = init_params(k_p)

    outs, h_state = radar_rnn2_forward(x, h0, params)
    outs = jax.block_until_ready(outs)
    h_state = jax.block_until_ready(h_state)

    ref_outs, ref_h = reference_forward(x, h0, params)
    assert outs.shape == (B, T, 1) and h_state.shape == (NUM_LAYERS, B, HIDDEN)
    assert jnp.allclose(outs, ref_outs, atol=2e-5, rtol=2e-5)
    assert jnp.allclose(h_state, ref_h, atol=2e-5, rtol=2e-5)

    print("KERNEL_OK")
</pallas_src>

<mosaic_0001>
module attributes {stable_mosaic.version = 11 : i64} {
  func.func @_rnn_chunk_kernel(%arg0: i32, %arg1: memref<8x2x32xf32, #tpu.memory_space<vmem>>, %arg2: memref<4x2x32xf32, #tpu.memory_space<vmem>>, %arg3: memref<4x64x32xf32, #tpu.memory_space<vmem>>, %arg4: memref<4x1x32xf32, #tpu.memory_space<vmem>>, %arg5: memref<1x32xf32, #tpu.memory_space<vmem>>, %arg6: memref<1x1xf32, #tpu.memory_space<vmem>>, %arg7: memref<1x2x8xf32, #tpu.memory_space<vmem>>, %arg8: memref<4x2x32xf32, #tpu.memory_space<vmem>>, %arg9: memref<4x2x32xf32, #tpu.memory_space<vmem>>) attributes {dimension_semantics = [#tpu.dimension_semantics<arbitrary>], iteration_bounds = array<i64: 1>, scalar_prefetch = 0 : i64, scratch_operands = 1 : i64, tpu.core_type = #tpu.core_type<tc>, window_params = [{transform_indices = @transform_0, window_bounds = array<i64: 8, 2, 32>}, {pipeline_mode = #tpu.pipeline_mode<synchronous>, transform_indices = @transform_1, window_bounds = array<i64: 4, 2, 32>}, {pipeline_mode = #tpu.pipeline_mode<synchronous>, transform_indices = @transform_2, window_bounds = array<i64: 4, 64, 32>}, {pipeline_mode = #tpu.pipeline_mode<synchronous>, transform_indices = @transform_3, window_bounds = array<i64: 4, 1, 32>}, {pipeline_mode = #tpu.pipeline_mode<synchronous>, transform_indices = @transform_4, window_bounds = array<i64: 1, 32>}, {pipeline_mode = #tpu.pipeline_mode<synchronous>, transform_indices = @transform_5, window_bounds = array<i64: 1, 1>}, {transform_indices = @transform_6, window_bounds = array<i64: 1, 2, 8>}, {pipeline_mode = #tpu.pipeline_mode<synchronous>, transform_indices = @transform_7, window_bounds = array<i64: 4, 2, 32>}]} {
    %c0_i32 = arith.constant 0 : i32
    %0 = arith.cmpi eq, %arg0, %c0_i32 : i32
    %1 = arith.extui %0 : i1 to i32
    %c0_i32_0 = arith.constant 0 : i32
    %2 = arith.cmpi ne, %1, %c0_i32_0 : i32
    scf.if %2 {
      %c0_120 = arith.constant 0 : index
      %c0_121 = arith.constant 0 : index
      %c0_122 = arith.constant 0 : index
      %334 = vector.load %arg2[%c0_120, %c0_121, %c0_122] : memref<4x2x32xf32, #tpu.memory_space<vmem>>, vector<4x2x32xf32>
      %c0_123 = arith.constant 0 : index
      %c0_124 = arith.constant 0 : index
      %c0_125 = arith.constant 0 : index
      %335 = vector.load %arg9[%c0_123, %c0_124, %c0_125] : memref<4x2x32xf32, #tpu.memory_space<vmem>>, vector<4x2x32xf32>
      tpu.vector_store %arg9[%c0_123, %c0_124, %c0_125], %334 {strides = array<i32>} : memref<4x2x32xf32, #tpu.memory_space<vmem>>, vector<4x2x32xf32>,
    } else {
    }
    %c0 = arith.constant 0 : index
    %c0_1 = arith.constant 0 : index
    %c0_2 = arith.constant 0 : index
    %3 = vector.load %arg3[%c0, %c0_1, %c0_2] : memref<4x64x32xf32, #tpu.memory_space<vmem>>, vector<1x64x32xf32>
    %4 = vector.shape_cast %3 : vector<1x64x32xf32> to vector<64x32xf32>
    %c1 = arith.constant 1 : index
    %c0_3 = arith.constant 0 : index
    %c0_4 = arith.constant 0 : index
    %5 = vector.load %arg3[%c1, %c0_3, %c0_4] : memref<4x64x32xf32, #tpu.memory_space<vmem>>, vector<1x64x32xf32>
    %6 = vector.shape_cast %5 : vector<1x64x32xf32> to vector<64x32xf32>
    %c2 = arith.constant 2 : index
    %c0_5 = arith.constant 0 : index
    %c0_6 = arith.constant 0 : index
    %7 = vector.load %arg3[%c2, %c0_5, %c0_6] : memref<4x64x32xf32, #tpu.memory_space<vmem>>, vector<1x64x32xf32>
    %8 = vector.shape_cast %7 : vector<1x64x32xf32> to vector<64x32xf32>
    %c3 = arith.constant 3 : index
    %c0_7 = arith.constant 0 : index
    %c0_8 = arith.constant 0 : index
    %9 = vector.load %arg3[%c3, %c0_7, %c0_8] : memref<4x64x32xf32, #tpu.memory_space<vmem>>, vector<1x64x32xf32>
    %10 = vector.shape_cast %9 : vector<1x64x32xf32> to vector<64x32xf32>
    %c0_9 = arith.constant 0 : index
    %c0_10 = arith.constant 0 : index
    %c0_11 = arith.constant 0 : index
    %11 = vector.load %arg4[%c0_9, %c0_10, %c0_11] : memref<4x1x32xf32, #tpu.memory_space<vmem>>, vector<1x1x32xf32>
    %12 = vector.shape_cast %11 : vector<1x1x32xf32> to vector<1x32xf32>
    %13 = vector.shape_cast %12 : vector<1x32xf32> to vector<1x32xf32>
    %14 = vector.broadcast %13 : vector<1x32xf32> to vector<2x32xf32>
    %c1_12 = arith.constant 1 : index
    %c0_13 = arith.constant 0 : index
    %c0_14 = arith.constant 0 : index
    %15 = vector.load %arg4[%c1_12, %c0_13, %c0_14] : memref<4x1x32xf32, #tpu.memory_space<vmem>>, vector<1x1x32xf32>
    %16 = vector.shape_cast %15 : vector<1x1x32xf32> to vector<1x32xf32>
    %17 = vector.shape_cast %16 : vector<1x32xf32> to vector<1x32xf32>
    %18 = vector.broadcast %17 : vector<1x32xf32> to vector<2x32xf32>
    %c2_15 = arith.constant 2 : index
    %c0_16 = arith.constant 0 : index
    %c0_17 = arith.constant 0 : index
    %19 = vector.load %arg4[%c2_15, %c0_16, %c0_17] : memref<4x1x32xf32, #tpu.memory_space<vmem>>, vector<1x1x32xf32>
    %20 = vector.shape_cast %19 : vector<1x1x32xf32> to vector<1x32xf32>
    %21 = vector.shape_cast %20 : vector<1x32xf32> to vector<1x32xf32>
    %22 = vector.broadcast %21 : vector<1x32xf32> to vector<2x32xf32>
    %c3_18 = arith.constant 3 : index
    %c0_19 = arith.constant 0 : index
    %c0_20 = arith.constant 0 : index
    %23 = vector.load %arg4[%c3_18, %c0_19, %c0_20] : memref<4x1x32xf32, #tpu.memory_space<vmem>>, vector<1x1x32xf32>
    %24 = vector.shape_cast %23 : vector<1x1x32xf32> to vector<1x32xf32>
    %25 = vector.shape_cast %24 : vector<1x32xf32> to vector<1x32xf32>
    %26 = vector.broadcast %25 : vector<1x32xf32> to vector<2x32xf32>
    %c0_21 = arith.constant 0 : index
    %c0_22 = arith.constant 0 : index
    %27 = vector.load %arg5[%c0_21, %c0_22] : memref<1x32xf32, #tpu.memory_space<vmem>>, vector<1x32xf32>
    %28 = vector.shape_cast %27 : vector<1x32xf32> to vector<1x32xf32>
    %29 = vector.broadcast %28 : vector<1x32xf32> to vector<2x32xf32>
    %c0_23 = arith.constant 0 : index
    %c0_24 = arith.constant 0 : index
    %30 = vector.load %arg6[%c0_23, %c0_24] : memref<1x1xf32, #tpu.memory_space<vmem>>, vector<1x1xf32>
    %31 = vector.shape_cast %30 : vector<1x1xf32> to vector<1x1xf32>
    %32 = vector.broadcast %31 : vector<1x1xf32> to vector<2x1xf32>
    %33 = tpu.iota {dimensions = array<i32: 1>} : vector<2x8xi32>
    %c8_i32 = arith.constant 8 : i32
    %34 = arith.muli %arg0, %c8_i32 : i32
    %c0_25 = arith.constant 0 : index
    %c0_26 = arith.constant 0 : index
    %c0_27 = arith.constant 0 : index
    %35 = vector.load %arg9[%c0_25, %c0_26, %c0_27] : memref<4x2x32xf32, #tpu.memory_space<vmem>>, vector<1x2x32xf32>
    %36 = vector.shape_cast %35 : vector<1x2x32xf32> to vector<2x32xf32>
    %c1_28 = arith.constant 1 : index
    %c0_29 = arith.constant 0 : index
    %c0_30 = arith.constant 0 : index
    %37 = vector.load %arg9[%c1_28, %c0_29, %c0_30] : memref<4x2x32xf32, #tpu.memory_space<vmem>>, vector<1x2x32xf32>
    %38 = vector.shape_cast %37 : vector<1x2x32xf32> to vector<2x32xf32>
    %c2_31 = arith.constant 2 : index
    %c0_32 = arith.constant 0 : index
    %c0_33 = arith.constant 0 : index
    %39 = vector.load %arg9[%c2_31, %c0_32, %c0_33] : memref<4x2x32xf32, #tpu.memory_space<vmem>>, vector<1x2x32xf32>
    %40 = vector.shape_cast %39 : vector<1x2x32xf32> to vector<2x32xf32>
    %c3_34 = arith.constant 3 : index
    %c0_35 = arith.constant 0 : index
    %c0_36 = arith.constant 0 : index
    %41 = vector.load %arg9[%c3_34, %c0_35, %c0_36] : memref<4x2x32xf32, #tpu.memory_space<vmem>>, vector<1x2x32xf32>
    %42 = vector.shape_cast %41 : vector<1x2x32xf32> to vector<2x32xf32>
    %cst = arith.constant 0.000000e+00 : f32
    %43 = vector.broadcast %cst : f32 to vector<2x8xf32>
    %c0_i32_37 = arith.constant 0 : i32
    %44 = arith.index_cast %c0_i32_37 : i32 to index
    %c0_38 = arith.constant 0 : index
    %c0_39 = arith.constant 0 : index
    %45 = vector.load %arg1[%44, %c0_38, %c0_39] : memref<8x2x32xf32, #tpu.memory_space<vmem>>, vector<1x2x32xf32>
    %46 = vector.shape_cast %45 : vector<1x2x32xf32> to vector<2x32xf32>
    %47 = tpu.concatenate %46, %36 in 1 : vector<2x32xf32>, vector<2x32xf32> -> vector<2x64xf32>
    %cst_40 = arith.constant dense<0.000000e+00> : vector<2x32xf32>
    %48 = tpu.matmul %47, %4, %cst_40 {dimension_numbers = #tpu.dot_dimension_numbers<[1], [0], [0], [1], [0, 0, 1, 1], [], []>} : vector<2x64xf32>, vector<64x32xf32>, vector<2x32xf32> -> vector<2x32xf32>
    %49 = arith.addf %48, %14 : vector<2x32xf32>
    %50 = math.tanh %49 : vector<2x32xf32>
    %51 = tpu.concatenate %50, %38 in 1 : vector<2x32xf32>, vector<2x32xf32> -> vector<2x64xf32>
    %cst_41 = arith.constant dense<0.000000e+00> : vector<2x32xf32>
    %52 = tpu.matmul %51, %6, %cst_41 {dimension_numbers = #tpu.dot_dimension_numbers<[1], [0], [0], [1], [0, 0, 1, 1], [], []>} : vector<2x64xf32>, vector<64x32xf32>, vector<2x32xf32> -> vector<2x32xf32>
    %53 = arith.addf %52, %18 : vector<2x32xf32>
    %54 = math.tanh %53 : vector<2x32xf32>
    %55 = tpu.concatenate %54, %40 in 1 : vector<2x32xf32>, vector<2x32xf32> -> vector<2x64xf32>
    %cst_42 = arith.constant dense<0.000000e+00> : vector<2x32xf32>
    %56 = tpu.matmul %55, %8, %cst_42 {dimension_numbers = #tpu.dot_dimension_numbers<[1], [0], [0], [1], [0, 0, 1, 1], [], []>} : vector<2x64xf32>, vector<64x32xf32>, vector<2x32xf32> -> vector<2x32xf32>
    %57 = arith.addf %56, %22 : vector<2x32xf32>
    %58 = math.tanh %57 : vector<2x32xf32>
    %59 = tpu.concatenate %58, %42 in 1 : vector<2x32xf32>, vector<2x32xf32> -> vector<2x64xf32>
    %cst_43 = arith.constant dense<0.000000e+00> : vector<2x32xf32>
    %60 = tpu.matmul %59, %10, %cst_43 {dimension_numbers = #tpu.dot_dimension_numbers<[1], [0], [0], [1], [0, 0, 1, 1], [], []>} : vector<2x64xf32>, vector<64x32xf32>, vector<2x32xf32> -> vector<2x32xf32>
    %61 = arith.addf %60, %26 : vector<2x32xf32>
    %62 = math.tanh %61 : vector<2x32xf32>
    %63 = arith.mulf %62, %29 : vector<2x32xf32>
    %cst_44 = arith.constant dense<0.000000e+00> : vector<2xf32>
    %64 = vector.multi_reduction <add>, %63, %cst_44 [1] : vector<2x32xf32> to vector<2xf32>
    %65 = vector.shape_cast %64 : vector<2xf32> to vector<2x1xf32>
    %66 = arith.addf %65, %32 : vector<2x1xf32>
    %67 = vector.broadcast %c0_i32_37 : i32 to vector<2x8xi32>
    %68 = arith.cmpi eq, %33, %67 : vector<2x8xi32>
    %69 = vector.shape_cast %66 : vector<2x1xf32> to vector<2x1xf32>
    %70 = vector.broadcast %69 : vector<2x1xf32> to vector<2x8xf32>
    %71 = arith.select %68, %70, %43 : vector<2x8xi1>, vector<2x8xf32>
    %72 = arith.addi %34, %c0_i32_37 : i32
    %c8_i32_45 = arith.constant 8 : i32
    %73 = arith.cmpi slt, %72, %c8_i32_45 : i32
    %74 = arith.select %73, %50, %36 : vector<2x32xf32>
    %75 = arith.select %73, %54, %38 : vector<2x32xf32>
    %76 = arith.select %73, %58, %40 : vector<2x32xf32>
    %77 = arith.select %73, %62, %42 : vector<2x32xf32>
    %c1_i32 = arith.constant 1 : i32
    %78 = arith.index_cast %c1_i32 : i32 to index
    %c0_46 = arith.constant 0 : index
    %c0_47 = arith.constant 0 : index
    %79 = vector.load %arg1[%78, %c0_46, %c0_47] : memref<8x2x32xf32, #tpu.memory_space<vmem>>, vector<1x2x32xf32>
    %80 = vector.shape_cast %79 : vector<1x2x32xf32> to vector<2x32xf32>
    %81 = tpu.concatenate %80, %74 in 1 : vector<2x32xf32>, vector<2x32xf32> -> vector<2x64xf32>
    %cst_48 = arith.constant dense<0.000000e+00> : vector<2x32xf32>
    %82 = tpu.matmul %81, %4, %cst_48 {dimension_numbers = #tpu.dot_dimension_numbers<[1], [0], [0], [1], [0, 0, 1, 1], [], []>} : vector<2x64xf32>, vector<64x32xf32>, vector<2x32xf32> -> vector<2x32xf32>
    %83 = arith.addf %82, %14 : vector<2x32xf32>
    %84 = math.tanh %83 : vector<2x32xf32>
    %85 = tpu.concatenate %84, %75 in 1 : vector<2x32xf32>, vector<2x32xf32> -> vector<2x64xf32>
    %cst_49 = arith.constant dense<0.000000e+00> : vector<2x32xf32>
    %86 = tpu.matmul %85, %6, %cst_49 {dimension_numbers = #tpu.dot_dimension_numbers<[1], [0], [0], [1], [0, 0, 1, 1], [], []>} : vector<2x64xf32>, vector<64x32xf32>, vector<2x32xf32> -> vector<2x32xf32>
    %87 = arith.addf %86, %18 : vector<2x32xf32>
    %88 = math.tanh %87 : vector<2x32xf32>
    %89 = tpu.concatenate %88, %76 in 1 : vector<2x32xf32>, vector<2x32xf32> -> vector<2x64xf32>
    %cst_50 = arith.constant dense<0.000000e+00> : vector<2x32xf32>
    %90 = tpu.matmul %89, %8, %cst_50 {dimension_numbers = #tpu.dot_dimension_numbers<[1], [0], [0], [1], [0, 0, 1, 1], [], []>} : vector<2x64xf32>, vector<64x32xf32>, vector<2x32xf32> -> vector<2x32xf32>
    %91 = arith.addf %90, %22 : vector<2x32xf32>
    %92 = math.tanh %91 : vector<2x32xf32>
    %93 = tpu.concatenate %92, %77 in 1 : vector<2x32xf32>, vector<2x32xf32> -> vector<2x64xf32>
    %cst_51 = arith.constant dense<0.000000e+00> : vector<2x32xf32>
    %94 = tpu.matmul %93, %10, %cst_51 {dimension_numbers = #tpu.dot_dimension_numbers<[1], [0], [0], [1], [0, 0, 1, 1], [], []>} : vector<2x64xf32>, vector<64x32xf32>, vector<2x32xf32> -> vector<2x32xf32>
    %95 = arith.addf %94, %26 : vector<2x32xf32>
    %96 = math.tanh %95 : vector<2x32xf32>
    %97 = arith.mulf %96, %29 : vector<2x32xf32>
    %cst_52 = arith.constant dense<0.000000e+00> : vector<2xf32>
    %98 = vector.multi_reduction <add>, %97, %cst_52 [1] : vector<2x32xf32> to vector<2xf32>
    %99 = vector.shape_cast %98 : vector<2xf32> to vector<2x1xf32>
    %100 = arith.addf %99, %32 : vector<2x1xf32>
    %101 = vector.broadcast %c1_i32 : i32 to vector<2x8xi32>
    %102 = arith.cmpi eq, %33, %101 : vector<2x8xi32>
    %103 = vector.shape_cast %100 : vector<2x1xf32> to vector<2x1xf32>
    %104 = vector.broadcast %103 : vector<2x1xf32> to vector<2x8xf32>
    %105 = arith.select %102, %104, %71 : vector<2x8xi1>, vector<2x8xf32>
    %106 = arith.addi %34, %c1_i32 : i32
    %c8_i32_53 = arith.constant 8 : i32
    %107 = arith.cmpi slt, %106, %c8_i32_53 : i32
    %108 = arith.select %107, %84, %74 : vector<2x32xf32>
    %109 = arith.select %107, %88, %75 : vector<2x32xf32>
    %110 = arith.select %107, %92, %76 : vector<2x32xf32>
    %111 = arith.select %107, %96, %77 : vector<2x32xf32>
    %c2_i32 = arith.constant 2 : i32
    %112 = arith.index_cast %c2_i32 : i32 to index
    %c0_54 = arith.constant 0 : index
    %c0_55 = arith.constant 0 : index
    %113 = vector.load %arg1[%112, %c0_54, %c0_55] : memref<8x2x32xf32, #tpu.memory_space<vmem>>, vector<1x2x32xf32>
    %114 = vector.shape_cast %113 : vector<1x2x32xf32> to vector<2x32xf32>
    %115 = tpu.concatenate %114, %108 in 1 : vector<2x32xf32>, vector<2x32xf32> -> vector<2x64xf32>
    %cst_56 = arith.constant dense<0.000000e+00> : vector<2x32xf32>
    %116 = tpu.matmul %115, %4, %cst_56 {dimension_numbers = #tpu.dot_dimension_numbers<[1], [0], [0], [1], [0, 0, 1, 1], [], []>} : vector<2x64xf32>, vector<64x32xf32>, vector<2x32xf32> -> vector<2x32xf32>
    %117 = arith.addf %116, %14 : vector<2x32xf32>
    %118 = math.tanh %117 : vector<2x32xf32>
    %119 = tpu.concatenate %118, %109 in 1 : vector<2x32xf32>, vector<2x32xf32> -> vector<2x64xf32>
    %cst_57 = arith.constant dense<0.000000e+00> : vector<2x32xf32>
    %120 = tpu.matmul %119, %6, %cst_57 {dimension_numbers = #tpu.dot_dimension_numbers<[1], [0], [0], [1], [0, 0, 1, 1], [], []>} : vector<2x64xf32>, vector<64x32xf32>, vector<2x32xf32> -> vector<2x32xf32>
    %121 = arith.addf %120, %18 : vector<2x32xf32>
    %122 = math.tanh %121 : vector<2x32xf32>
    %123 = tpu.concatenate %122, %110 in 1 : vector<2x32xf32>, vector<2x32xf32> -> vector<2x64xf32>
    %cst_58 = arith.constant dense<0.000000e+00> : vector<2x32xf32>
    %124 = tpu.matmul %123, %8, %cst_58 {dimension_numbers = #tpu.dot_dimension_numbers<[1], [0], [0], [1], [0, 0, 1, 1], [], []>} : vector<2x64xf32>, vector<64x32xf32>, vector<2x32xf32> -> vector<2x32xf32>
    %125 = arith.addf %124, %22 : vector<2x32xf32>
    %126 = math.tanh %125 : vector<2x32xf32>
    %127 = tpu.concatenate %126, %111 in 1 : vector<2x32xf32>, vector<2x32xf32> -> vector<2x64xf32>
    %cst_59 = arith.constant dense<0.000000e+00> : vector<2x32xf32>
    %128 = tpu.matmul %127, %10, %cst_59 {dimension_numbers = #tpu.dot_dimension_numbers<[1], [0], [0], [1], [0, 0, 1, 1], [], []>} : vector<2x64xf32>, vector<64x32xf32>, vector<2x32xf32> -> vector<2x32xf32>
    %129 = arith.addf %128, %26 : vector<2x32xf32>
    %130 = math.tanh %129 : vector<2x32xf32>
    %131 = arith.mulf %130, %29 : vector<2x32xf32>
    %cst_60 = arith.constant dense<0.000000e+00> : vector<2xf32>
    %132 = vector.multi_reduction <add>, %131, %cst_60 [1] : vector<2x32xf32> to vector<2xf32>
    %133 = vector.shape_cast %132 : vector<2xf32> to vector<2x1xf32>
    %134 = arith.addf %133, %32 : vector<2x1xf32>
    %135 = vector.broadcast %c2_i32 : i32 to vector<2x8xi32>
    %136 = arith.cmpi eq, %33, %135 : vector<2x8xi32>
    %137 = vector.shape_cast %134 : vector<2x1xf32> to vector<2x1xf32>
    %138 = vector.broadcast %137 : vector<2x1xf32> to vector<2x8xf32>
    %139 = arith.select %136, %138, %105 : vector<2x8xi1>, vector<2x8xf32>
    %140 = arith.addi %34, %c2_i32 : i32
    %c8_i32_61 = arith.constant 8 : i32
    %141 = arith.cmpi slt, %140, %c8_i32_61 : i32
    %142 = arith.select %141, %118, %108 : vector<2x32xf32>
    %143 = arith.select %141, %122, %109 : vector<2x32xf32>
    %144 = arith.select %141, %126, %110 : vector<2x32xf32>
    %145 = arith.select %141, %130, %111 : vector<2x32xf32>
    %c3_i32 = arith.constant 3 : i32
    %146 = arith.index_cast %c3_i32 : i32 to index
    %c0_62 = arith.constant 0 : index
    %c0_63 = arith.constant 0 : index
    %147 = vector.load %arg1[%146, %c0_62, %c0_63] : memref<8x2x32xf32, #tpu.memory_space<vmem>>, vector<1x2x32xf32>
    %148 = vector.shape_cast %147 : vector<1x2x32xf32> to vector<2x32xf32>
    %149 = tpu.concatenate %148, %142 in 1 : vector<2x32xf32>, vector<2x32xf32> -> vector<2x64xf32>
    %cst_64 = arith.constant dense<0.000000e+00> : vector<2x32xf32>
    %150 = tpu.matmul %149, %4, %cst_64 {dimension_numbers = #tpu.dot_dimension_numbers<[1], [0], [0], [1], [0, 0, 1, 1], [], []>} : vector<2x64xf32>, vector<64x32xf32>, vector<2x32xf32> -> vector<2x32xf32>
    %151 = arith.addf %150, %14 : vector<2x32xf32>
    %152 = math.tanh %151 : vector<2x32xf32>
    %153 = tpu.concatenate %152, %143 in 1 : vector<2x32xf32>, vector<2x32xf32> -> vector<2x64xf32>
    %cst_65 = arith.constant dense<0.000000e+00> : vector<2x32xf32>
    %154 = tpu.matmul %153, %6, %cst_65 {dimension_numbers = #tpu.dot_dimension_numbers<[1], [0], [0], [1], [0, 0, 1, 1], [], []>} : vector<2x64xf32>, vector<64x32xf32>, vector<2x32xf32> -> vector<2x32xf32>
    %155 = arith.addf %154, %18 : vector<2x32xf32>
    %156 = math.tanh %155 : vector<2x32xf32>
    %157 = tpu.concatenate %156, %144 in 1 : vector<2x32xf32>, vector<2x32xf32> -> vector<2x64xf32>
    %cst_66 = arith.constant dense<0.000000e+00> : vector<2x32xf32>
    %158 = tpu.matmul %157, %8, %cst_66 {dimension_numbers = #tpu.dot_dimension_numbers<[1], [0], [0], [1], [0, 0, 1, 1], [], []>} : vector<2x64xf32>, vector<64x32xf32>, vector<2x32xf32> -> vector<2x32xf32>
    %159 = arith.addf %158, %22 : vector<2x32xf32>
    %160 = math.tanh %159 : vector<2x32xf32>
    %161 = tpu.concatenate %160, %145 in 1 : vector<2x32xf32>, vector<2x32xf32> -> vector<2x64xf32>
    %cst_67 = arith.constant dense<0.000000e+00> : vector<2x32xf32>
    %162 = tpu.matmul %161, %10, %cst_67 {dimension_numbers = #tpu.dot_dimension_numbers<[1], [0], [0], [1], [0, 0, 1, 1], [], []>} : vector<2x64xf32>, vector<64x32xf32>, vector<2x32xf32> -> vector<2x32xf32>
    %163 = arith.addf %162, %26 : vector<2x32xf32>
    %164 = math.tanh %163 : vector<2x32xf32>
    %165 = arith.mulf %164, %29 : vector<2x32xf32>
    %cst_68 = arith.constant dense<0.000000e+00> : vector<2xf32>
    %166 = vector.multi_reduction <add>, %165, %cst_68 [1] : vector<2x32xf32> to vector<2xf32>
    %167 = vector.shape_cast %166 : vector<2xf32> to vector<2x1xf32>
    %168 = arith.addf %167, %32 : vector<2x1xf32>
    %169 = vector.broadcast %c3_i32 : i32 to vector<2x8xi32>
    %170 = arith.cmpi eq, %33, %169 : vector<2x8xi32>
    %171 = vector.shape_cast %168 : vector<2x1xf32> to vector<2x1xf32>
    %172 = vector.broadcast %171 : vector<2x1xf32> to vector<2x8xf32>
    %173 = arith.select %170, %172, %139 : vector<2x8xi1>, vector<2x8xf32>
    %174 = arith.addi %34, %c3_i32 : i32
    %c8_i32_69 = arith.constant 8 : i32
    %175 = arith.cmpi slt, %174, %c8_i32_69 : i32
    %176 = arith.select %175, %152, %142 : vector<2x32xf32>
    %177 = arith.select %175, %156, %143 : vector<2x32xf32>
    %178 = arith.select %175, %160, %144 : vector<2x32xf32>
    %179 = arith.select %175, %164, %145 : vector<2x32xf32>
    %c4_i32 = arith.constant 4 : i32
    %180 = arith.index_cast %c4_i32 : i32 to index
    %c0_70 = arith.constant 0 : index
    %c0_71 = arith.constant 0 : index
    %181 = vector.load %arg1[%180, %c0_70, %c0_71] : memref<8x2x32xf32, #tpu.memory_space<vmem>>, vector<1x2x32xf32>
    %182 = vector.shape_cast %181 : vector<1x2x32xf32> to vector<2x32xf32>
    %183 = tpu.concatenate %182, %176 in 1 : vector<2x32xf32>, vector<2x32xf32> -> vector<2x64xf32>
    %cst_72 = arith.constant dense<0.000000e+00> : vector<2x32xf32>
    %184 = tpu.matmul %183, %4, %cst_72 {dimension_numbers = #tpu.dot_dimension_numbers<[1], [0], [0], [1], [0, 0, 1, 1], [], []>} : vector<2x64xf32>, vector<64x32xf32>, vector<2x32xf32> -> vector<2x32xf32>
    %185 = arith.addf %184, %14 : vector<2x32xf32>
    %186 = math.tanh %185 : vector<2x32xf32>
    %187 = tpu.concatenate %186, %177 in 1 : vector<2x32xf32>, vector<2x32xf32> -> vector<2x64xf32>
    %cst_73 = arith.constant dense<0.000000e+00> : vector<2x32xf32>
    %188 = tpu.matmul %187, %6, %cst_73 {dimension_numbers = #tpu.dot_dimension_numbers<[1], [0], [0], [1], [0, 0, 1, 1], [], []>} : vector<2x64xf32>, vector<64x32xf32>, vector<2x32xf32> -> vector<2x32xf32>
    %189 = arith.addf %188, %18 : vector<2x32xf32>
    %190 = math.tanh %189 : vector<2x32xf32>
    %191 = tpu.concatenate %190, %178 in 1 : vector<2x32xf32>, vector<2x32xf32> -> vector<2x64xf32>
    %cst_74 = arith.constant dense<0.000000e+00> : vector<2x32xf32>
    %192 = tpu.matmul %191, %8, %cst_74 {dimension_numbers = #tpu.dot_dimension_numbers<[1], [0], [0], [1], [0, 0, 1, 1], [], []>} : vector<2x64xf32>, vector<64x32xf32>, vector<2x32xf32> -> vector<2x32xf32>
    %193 = arith.addf %192, %22 : vector<2x32xf32>
    %194 = math.tanh %193 : vector<2x32xf32>
    %195 = tpu.concatenate %194, %179 in 1 : vector<2x32xf32>, vector<2x32xf32> -> vector<2x64xf32>
    %cst_75 = arith.constant dense<0.000000e+00> : vector<2x32xf32>
    %196 = tpu.matmul %195, %10, %cst_75 {dimension_numbers = #tpu.dot_dimension_numbers<[1], [0], [0], [1], [0, 0, 1, 1], [], []>} : vector<2x64xf32>, vector<64x32xf32>, vector<2x32xf32> -> vector<2x32xf32>
    %197 = arith.addf %196, %26 : vector<2x32xf32>
    %198 = math.tanh %197 : vector<2x32xf32>
    %199 = arith.mulf %198, %29 : vector<2x32xf32>
    %cst_76 = arith.constant dense<0.000000e+00> : vector<2xf32>
    %200 = vector.multi_reduction <add>, %199, %cst_76 [1] : vector<2x32xf32> to vector<2xf32>
    %201 = vector.shape_cast %200 : vector<2xf32> to vector<2x1xf32>
    %202 = arith.addf %201, %32 : vector<2x1xf32>
    %203 = vector.broadcast %c4_i32 : i32 to vector<2x8xi32>
    %204 = arith.cmpi eq, %33, %203 : vector<2x8xi32>
    %205 = vector.shape_cast %202 : vector<2x1xf32> to vector<2x1xf32>
    %206 = vector.broadcast %205 : vector<2x1xf32> to vector<2x8xf32>
    %207 = arith.select %204, %206, %173 : vector<2x8xi1>, vector<2x8xf32>
    %208 = arith.addi %34, %c4_i32 : i32
    %c8_i32_77 = arith.constant 8 : i32
    %209 = arith.cmpi slt, %208, %c8_i32_77 : i32
    %210 = arith.select %209, %186, %176 : vector<2x32xf32>
    %211 = arith.select %209, %190, %177 : vector<2x32xf32>
    %212 = arith.select %209, %194, %178 : vector<2x32xf32>
    %213 = arith.select %209, %198, %179 : vector<2x32xf32>
    %c5_i32 = arith.constant 5 : i32
    %214 = arith.index_cast %c5_i32 : i32 to index
    %c0_78 = arith.constant 0 : index
    %c0_79 = arith.constant 0 : index
    %215 = vector.load %arg1[%214, %c0_78, %c0_79] : memref<8x2x32xf32, #tpu.memory_space<vmem>>, vector<1x2x32xf32>
    %216 = vector.shape_cast %215 : vector<1x2x32xf32> to vector<2x32xf32>
    %217 = tpu.concatenate %216, %210 in 1 : vector<2x32xf32>, vector<2x32xf32> -> vector<2x64xf32>
    %cst_80 = arith.constant dense<0.000000e+00> : vector<2x32xf32>
    %218 = tpu.matmul %217, %4, %cst_80 {dimension_numbers = #tpu.dot_dimension_numbers<[1], [0], [0], [1], [0, 0, 1, 1], [], []>} : vector<2x64xf32>, vector<64x32xf32>, vector<2x32xf32> -> vector<2x32xf32>
    %219 = arith.addf %218, %14 : vector<2x32xf32>
    %220 = math.tanh %219 : vector<2x32xf32>
    %221 = tpu.concatenate %220, %211 in 1 : vector<2x32xf32>, vector<2x32xf32> -> vector<2x64xf32>
    %cst_81 = arith.constant dense<0.000000e+00> : vector<2x32xf32>
    %222 = tpu.matmul %221, %6, %cst_81 {dimension_numbers = #tpu.dot_dimension_numbers<[1], [0], [0], [1], [0, 0, 1, 1], [], []>} : vector<2x64xf32>, vector<64x32xf32>, vector<2x32xf32> -> vector<2x32xf32>
    %223 = arith.addf %222, %18 : vector<2x32xf32>
    %224 = math.tanh %223 : vector<2x32xf32>
    %225 = tpu.concatenate %224, %212 in 1 : vector<2x32xf32>, vector<2x32xf32> -> vector<2x64xf32>
    %cst_82 = arith.constant dense<0.000000e+00> : vector<2x32xf32>
    %226 = tpu.matmul %225, %8, %cst_82 {dimension_numbers = #tpu.dot_dimension_numbers<[1], [0], [0], [1], [0, 0, 1, 1], [], []>} : vector<2x64xf32>, vector<64x32xf32>, vector<2x32xf32> -> vector<2x32xf32>
    %227 = arith.addf %226, %22 : vector<2x32xf32>
    %228 = math.tanh %227 : vector<2x32xf32>
    %229 = tpu.concatenate %228, %213 in 1 : vector<2x32xf32>, vector<2x32xf32> -> vector<2x64xf32>
    %cst_83 = arith.constant dense<0.000000e+00> : vector<2x32xf32>
    %230 = tpu.matmul %229, %10, %cst_83 {dimension_numbers = #tpu.dot_dimension_numbers<[1], [0], [0], [1], [0, 0, 1, 1], [], []>} : vector<2x64xf32>, vector<64x32xf32>, vector<2x32xf32> -> vector<2x32xf32>
    %231 = arith.addf %230, %26 : vector<2x32xf32>
    %232 = math.tanh %231 : vector<2x32xf32>
    %233 = arith.mulf %232, %29 : vector<2x32xf32>
    %cst_84 = arith.constant dense<0.000000e+00> : vector<2xf32>
    %234 = vector.multi_reduction <add>, %233, %cst_84 [1] : vector<2x32xf32> to vector<2xf32>
    %235 = vector.shape_cast %234 : vector<2xf32> to vector<2x1xf32>
    %236 = arith.addf %235, %32 : vector<2x1xf32>
    %237 = vector.broadcast %c5_i32 : i32 to vector<2x8xi32>
    %238 = arith.cmpi eq, %33, %237 : vector<2x8xi32>
    %239 = vector.shape_cast %236 : vector<2x1xf32> to vector<2x1xf32>
    %240 = vector.broadcast %239 : vector<2x1xf32> to vector<2x8xf32>
    %241 = arith.select %238, %240, %207 : vector<2x8xi1>, vector<2x8xf32>
    %242 = arith.addi %34, %c5_i32 : i32
    %c8_i32_85 = arith.constant 8 : i32
    %243 = arith.cmpi slt, %242, %c8_i32_85 : i32
    %244 = arith.select %243, %220, %210 : vector<2x32xf32>
    %245 = arith.select %243, %224, %211 : vector<2x32xf32>
    %246 = arith.select %243, %228, %212 : vector<2x32xf32>
    %247 = arith.select %243, %232, %213 : vector<2x32xf32>
    %c6_i32 = arith.constant 6 : i32
    %248 = arith.index_cast %c6_i32 : i32 to index
    %c0_86 = arith.constant 0 : index
    %c0_87 = arith.constant 0 : index
    %249 = vector.load %arg1[%248, %c0_86, %c0_87] : memref<8x2x32xf32, #tpu.memory_space<vmem>>, vector<1x2x32xf32>
    %250 = vector.shape_cast %249 : vector<1x2x32xf32> to vector<2x32xf32>
    %251 = tpu.concatenate %250, %244 in 1 : vector<2x32xf32>, vector<2x32xf32> -> vector<2x64xf32>
    %cst_88 = arith.constant dense<0.000000e+00> : vector<2x32xf32>
    %252 = tpu.matmul %251, %4, %cst_88 {dimension_numbers = #tpu.dot_dimension_numbers<[1], [0], [0], [1], [0, 0, 1, 1], [], []>} : vector<2x64xf32>, vector<64x32xf32>, vector<2x32xf32> -> vector<2x32xf32>
    %253 = arith.addf %252, %14 : vector<2x32xf32>
    %254 = math.tanh %253 : vector<2x32xf32>
    %255 = tpu.concatenate %254, %245 in 1 : vector<2x32xf32>, vector<2x32xf32> -> vector<2x64xf32>
    %cst_89 = arith.constant dense<0.000000e+00> : vector<2x32xf32>
    %256 = tpu.matmul %255, %6, %cst_89 {dimension_numbers = #tpu.dot_dimension_numbers<[1], [0], [0], [1], [0, 0, 1, 1], [], []>} : vector<2x64xf32>, vector<64x32xf32>, vector<2x32xf32> -> vector<2x32xf32>
    %257 = arith.addf %256, %18 : vector<2x32xf32>
    %258 = math.tanh %257 : vector<2x32xf32>
    %259 = tpu.concatenate %258, %246 in 1 : vector<2x32xf32>, vector<2x32xf32> -> vector<2x64xf32>
    %cst_90 = arith.constant dense<0.000000e+00> : vector<2x32xf32>
    %260 = tpu.matmul %259, %8, %cst_90 {dimension_numbers = #tpu.dot_dimension_numbers<[1], [0], [0], [1], [0, 0, 1, 1], [], []>} : vector<2x64xf32>, vector<64x32xf32>, vector<2x32xf32> -> vector<2x32xf32>
    %261 = arith.addf %260, %22 : vector<2x32xf32>
    %262 = math.tanh %261 : vector<2x32xf32>
    %263 = tpu.concatenate %262, %247 in 1 : vector<2x32xf32>, vector<2x32xf32> -> vector<2x64xf32>
    %cst_91 = arith.constant dense<0.000000e+00> : vector<2x32xf32>
    %264 = tpu.matmul %263, %10, %cst_91 {dimension_numbers = #tpu.dot_dimension_numbers<[1], [0], [0], [1], [0, 0, 1, 1], [], []>} : vector<2x64xf32>, vector<64x32xf32>, vector<2x32xf32> -> vector<2x32xf32>
    %265 = arith.addf %264, %26 : vector<2x32xf32>
    %266 = math.tanh %265 : vector<2x32xf32>
    %267 = arith.mulf %266, %29 : vector<2x32xf32>
    %cst_92 = arith.constant dense<0.000000e+00> : vector<2xf32>
    %268 = vector.multi_reduction <add>, %267, %cst_92 [1] : vector<2x32xf32> to vector<2xf32>
    %269 = vector.shape_cast %268 : vector<2xf32> to vector<2x1xf32>
    %270 = arith.addf %269, %32 : vector<2x1xf32>
    %271 = vector.broadcast %c6_i32 : i32 to vector<2x8xi32>
    %272 = arith.cmpi eq, %33, %271 : vector<2x8xi32>
    %273 = vector.shape_cast %270 : vector<2x1xf32> to vector<2x1xf32>
    %274 = vector.broadcast %273 : vector<2x1xf32> to vector<2x8xf32>
    %275 = arith.select %272, %274, %241 : vector<2x8xi1>, vector<2x8xf32>
    %276 = arith.addi %34, %c6_i32 : i32
    %c8_i32_93 = arith.constant 8 : i32
    %277 = arith.cmpi slt, %276, %c8_i32_93 : i32
    %278 = arith.select %277, %254, %244 : vector<2x32xf32>
    %279 = arith.select %277, %258, %245 : vector<2x32xf32>
    %280 = arith.select %277, %262, %246 : vector<2x32xf32>
    %281 = arith.select %277, %266, %247 : vector<2x32xf32>
    %c7_i32 = arith.constant 7 : i32
    %282 = arith.index_cast %c7_i32 : i32 to index
    %c0_94 = arith.constant 0 : index
    %c0_95 = arith.constant 0 : index
    %283 = vector.load %arg1[%282, %c0_94, %c0_95] : memref<8x2x32xf32, #tpu.memory_space<vmem>>, vector<1x2x32xf32>
    %284 = vector.shape_cast %283 : vector<1x2x32xf32> to vector<2x32xf32>
    %285 = tpu.concatenate %284, %278 in 1 : vector<2x32xf32>, vector<2x32xf32> -> vector<2x64xf32>
    %cst_96 = arith.constant dense<0.000000e+00> : vector<2x32xf32>
    %286 = tpu.matmul %285, %4, %cst_96 {dimension_numbers = #tpu.dot_dimension_numbers<[1], [0], [0], [1], [0, 0, 1, 1], [], []>} : vector<2x64xf32>, vector<64x32xf32>, vector<2x32xf32> -> vector<2x32xf32>
    %287 = arith.addf %286, %14 : vector<2x32xf32>
    %288 = math.tanh %287 : vector<2x32xf32>
    %289 = tpu.concatenate %288, %279 in 1 : vector<2x32xf32>, vector<2x32xf32> -> vector<2x64xf32>
    %cst_97 = arith.constant dense<0.000000e+00> : vector<2x32xf32>
    %290 = tpu.matmul %289, %6, %cst_97 {dimension_numbers = #tpu.dot_dimension_numbers<[1], [0], [0], [1], [0, 0, 1, 1], [], []>} : vector<2x64xf32>, vector<64x32xf32>, vector<2x32xf32> -> vector<2x32xf32>
    %291 = arith.addf %290, %18 : vector<2x32xf32>
    %292 = math.tanh %291 : vector<2x32xf32>
    %293 = tpu.concatenate %292, %280 in 1 : vector<2x32xf32>, vector<2x32xf32> -> vector<2x64xf32>
    %cst_98 = arith.constant dense<0.000000e+00> : vector<2x32xf32>
    %294 = tpu.matmul %293, %8, %cst_98 {dimension_numbers = #tpu.dot_dimension_numbers<[1], [0], [0], [1], [0, 0, 1, 1], [], []>} : vector<2x64xf32>, vector<64x32xf32>, vector<2x32xf32> -> vector<2x32xf32>
    %295 = arith.addf %294, %22 : vector<2x32xf32>
    %296 = math.tanh %295 : vector<2x32xf32>
    %297 = tpu.concatenate %296, %281 in 1 : vector<2x32xf32>, vector<2x32xf32> -> vector<2x64xf32>
    %cst_99 = arith.constant dense<0.000000e+00> : vector<2x32xf32>
    %298 = tpu.matmul %297, %10, %cst_99 {dimension_numbers = #tpu.dot_dimension_numbers<[1], [0], [0], [1], [0, 0, 1, 1], [], []>} : vector<2x64xf32>, vector<64x32xf32>, vector<2x32xf32> -> vector<2x32xf32>
    %299 = arith.addf %298, %26 : vector<2x32xf32>
    %300 = math.tanh %299 : vector<2x32xf32>
    %301 = arith.mulf %300, %29 : vector<2x32xf32>
    %cst_100 = arith.constant dense<0.000000e+00> : vector<2xf32>
    %302 = vector.multi_reduction <add>, %301, %cst_100 [1] : vector<2x32xf32> to vector<2xf32>
    %303 = vector.shape_cast %302 : vector<2xf32> to vector<2x1xf32>
    %304 = arith.addf %303, %32 : vector<2x1xf32>
    %305 = vector.broadcast %c7_i32 : i32 to vector<2x8xi32>
    %306 = arith.cmpi eq, %33, %305 : vector<2x8xi32>
    %307 = vector.shape_cast %304 : vector<2x1xf32> to vector<2x1xf32>
    %308 = vector.broadcast %307 : vector<2x1xf32> to vector<2x8xf32>
    %309 = arith.select %306, %308, %275 : vector<2x8xi1>, vector<2x8xf32>
    %310 = arith.addi %34, %c7_i32 : i32
    %c8_i32_101 = arith.constant 8 : i32
    %311 = arith.cmpi slt, %310, %c8_i32_101 : i32
    %312 = arith.select %311, %288, %278 : vector<2x32xf32>
    %313 = arith.select %311, %292, %279 : vector<2x32xf32>
    %314 = arith.select %311, %296, %280 : vector<2x32xf32>
    %315 = arith.select %311, %300, %281 : vector<2x32xf32>
    %c8_i32_102 = arith.constant 8 : i32
    %c0_103 = arith.constant 0 : index
    %c0_104 = arith.constant 0 : index
    %c0_105 = arith.constant 0 : index
    %316 = vector.load %arg7[%c0_103, %c0_104, %c0_105] : memref<1x2x8xf32, #tpu.memory_space<vmem>>, vector<1x2x8xf32>
    %317 = vector.shape_cast %316 : vector<1x2x8xf32> to vector<2x8xf32>
    %318 = vector.shape_cast %309 : vector<2x8xf32> to vector<1x2x8xf32>
    tpu.vector_store %arg7[%c0_103, %c0_104, %c0_105], %318 {strides = array<i32>} : memref<1x2x8xf32, #tpu.memory_space<vmem>>, vector<1x2x8xf32>,
    %c0_106 = arith.constant 0 : index
    %c0_107 = arith.constant 0 : index
    %c0_108 = arith.constant 0 : index
    %319 = vector.load %arg9[%c0_106, %c0_107, %c0_108] : memref<4x2x32xf32, #tpu.memory_space<vmem>>, vector<1x2x32xf32>
    %320 = vector.shape_cast %319 : vector<1x2x32xf32> to vector<2x32xf32>
    %321 = vector.shape_cast %312 : vector<2x32xf32> to vector<1x2x32xf32>
    tpu.vector_store %arg9[%c0_106, %c0_107, %c0_108], %321 {strides = array<i32>} : memref<4x2x32xf32, #tpu.memory_space<vmem>>, vector<1x2x32xf32>,
    %c1_109 = arith.constant 1 : index
    %c0_110 = arith.constant 0 : index
    %c0_111 = arith.constant 0 : index
    %322 = vector.load %arg9[%c1_109, %c0_110, %c0_111] : memref<4x2x32xf32, #tpu.memory_space<vmem>>, vector<1x2x32xf32>
    %323 = vector.shape_cast %322 : vector<1x2x32xf32> to vector<2x32xf32>
    %324 = vector.shape_cast %313 : vector<2x32xf32> to vector<1x2x32xf32>
    tpu.vector_store %arg9[%c1_109, %c0_110, %c0_111], %324 {strides = array<i32>} : memref<4x2x32xf32, #tpu.memory_space<vmem>>, vector<1x2x32xf32>,
    %c2_112 = arith.constant 2 : index
    %c0_113 = arith.constant 0 : index
    %c0_114 = arith.constant 0 : index
    %325 = vector.load %arg9[%c2_112, %c0_113, %c0_114] : memref<4x2x32xf32, #tpu.memory_space<vmem>>, vector<1x2x32xf32>
    %326 = vector.shape_cast %325 : vector<1x2x32xf32> to vector<2x32xf32>
    %327 = vector.shape_cast %314 : vector<2x32xf32> to vector<1x2x32xf32>
    tpu.vector_store %arg9[%c2_112, %c0_113, %c0_114], %327 {strides = array<i32>} : memref<4x2x32xf32, #tpu.memory_space<vmem>>, vector<1x2x32xf32>,
    %c3_115 = arith.constant 3 : index
    %c0_116 = arith.constant 0 : index
    %c0_117 = arith.constant 0 : index
    %328 = vector.load %arg9[%c3_115, %c0_116, %c0_117] : memref<4x2x32xf32, #tpu.memory_space<vmem>>, vector<1x2x32xf32>
    %329 = vector.shape_cast %328 : vector<1x2x32xf32> to vector<2x32xf32>
    %330 = vector.shape_cast %315 : vector<2x32xf32> to vector<1x2x32xf32>
    tpu.vector_store %arg9[%c3_115, %c0_116, %c0_117], %330 {strides = array<i32>} : memref<4x2x32xf32, #tpu.memory_space<vmem>>, vector<1x2x32xf32>,
    %c0_i32_118 = arith.constant 0 : i32
    %331 = arith.cmpi eq, %arg0, %c0_i32_118 : i32
    %332 = arith.extui %331 : i1 to i32
    %c0_i32_119 = arith.constant 0 : i32
    %333 = arith.cmpi ne, %332, %c0_i32_119 : i32
    scf.if %333 {
      %c0_120 = arith.constant 0 : index
      %c0_121 = arith.constant 0 : index
      %c0_122 = arith.constant 0 : index
      %334 = vector.load %arg8[%c0_120, %c0_121, %c0_122] : memref<4x2x32xf32, #tpu.memory_space<vmem>>, vector<1x2x32xf32>
      %335 = vector.shape_cast %334 : vector<1x2x32xf32> to vector<2x32xf32>
      %336 = vector.shape_cast %312 : vector<2x32xf32> to vector<1x2x32xf32>
      tpu.vector_store %arg8[%c0_120, %c0_121, %c0_122], %336 {strides = array<i32>} : memref<4x2x32xf32, #tpu.memory_space<vmem>>, vector<1x2x32xf32>,
      %c1_123 = arith.constant 1 : index
      %c0_124 = arith.constant 0 : index
      %c0_125 = arith.constant 0 : index
      %337 = vector.load %arg8[%c1_123, %c0_124, %c0_125] : memref<4x2x32xf32, #tpu.memory_space<vmem>>, vector<1x2x32xf32>
      %338 = vector.shape_cast %337 : vector<1x2x32xf32> to vector<2x32xf32>
      %339 = vector.shape_cast %313 : vector<2x32xf32> to vector<1x2x32xf32>
      tpu.vector_store %arg8[%c1_123, %c0_124, %c0_125], %339 {strides = array<i32>} : memref<4x2x32xf32, #tpu.memory_space<vmem>>, vector<1x2x32xf32>,
      %c2_126 = arith.constant 2 : index
      %c0_127 = arith.constant 0 : index
      %c0_128 = arith.constant 0 : index
      %340 = vector.load %arg8[%c2_126, %c0_127, %c0_128] : memref<4x2x32xf32, #tpu.memory_space<vmem>>, vector<1x2x32xf32>
      %341 = vector.shape_cast %340 : vector<1x2x32xf32> to vector<2x32xf32>
      %342 = vector.shape_cast %314 : vector<2x32xf32> to vector<1x2x32xf32>
      tpu.vector_store %arg8[%c2_126, %c0_127, %c0_128], %342 {strides = array<i32>} : memref<4x2x32xf32, #tpu.memory_space<vmem>>, vector<1x2x32xf32>,
      %c3_129 = arith.constant 3 : index
      %c0_130 = arith.constant 0 : index
      %c0_131 = arith.constant 0 : index
      %343 = vector.load %arg8[%c3_129, %c0_130, %c0_131] : memref<4x2x32xf32, #tpu.memory_space<vmem>>, vector<1x2x32xf32>
      %344 = vector.shape_cast %343 : vector<1x2x32xf32> to vector<2x32xf32>
      %345 = vector.shape_cast %315 : vector<2x32xf32> to vector<1x2x32xf32>
      tpu.vector_store %arg8[%c3_129, %c0_130, %c0_131], %345 {strides = array<i32>} : memref<4x2x32xf32, #tpu.memory_space<vmem>>, vector<1x2x32xf32>,
    } else {
    }
    return
  }
  func.func @transform_0(%arg0: i32) -> (i32, i32, i32) {
    %c0_i32 = arith.constant 0 : i32
    %c0_i32_0 = arith.constant 0 : i32
    %c0_i32_1 = arith.constant 0 : i32
    return %arg0, %c0_i32, %c0_i32_0 : i32, i32, i32
  }
  func.func @transform_1(%arg0: i32) -> (i32, i32, i32) {
    %c0_i32 = arith.constant 0 : i32
    %c0_i32_0 = arith.constant 0 : i32
    %c0_i32_1 = arith.constant 0 : i32
    %c0_i32_2 = arith.constant 0 : i32
    return %c0_i32, %c0_i32_0, %c0_i32_1 : i32, i32, i32
  }
  func.func @transform_2(%arg0: i32) -> (i32, i32, i32) {
    %c0_i32 = arith.constant 0 : i32
    %c0_i32_0 = arith.constant 0 : i32
    %c0_i32_1 = arith.constant 0 : i32
    %c0_i32_2 = arith.constant 0 : i32
    return %c0_i32, %c0_i32_0, %c0_i32_1 : i32, i32, i32
  }
  func.func @transform_3(%arg0: i32) -> (i32, i32, i32) {
    %c0_i32 = arith.constant 0 : i32
    %c0_i32_0 = arith.constant 0 : i32
    %c0_i32_1 = arith.constant 0 : i32
    %c0_i32_2 = arith.constant 0 : i32
    return %c0_i32, %c0_i32_0, %c0_i32_1 : i32, i32, i32
  }
  func.func @transform_4(%arg0: i32) -> (i32, i32) {
    %c0_i32 = arith.constant 0 : i32
    %c0_i32_0 = arith.constant 0 : i32
    %c0_i32_1 = arith.constant 0 : i32
    return %c0_i32, %c0_i32_0 : i32, i32
  }
  func.func @transform_5(%arg0: i32) -> (i32, i32) {
    %c0_i32 = arith.constant 0 : i32
    %c0_i32_0 = arith.constant 0 : i32
    %c0_i32_1 = arith.constant 0 : i32
    return %c0_i32, %c0_i32_0 : i32, i32
  }
  func.func @transform_6(%arg0: i32) -> (i32, i32, i32) {
    %c0_i32 = arith.constant 0 : i32
    %c0_i32_0 = arith.constant 0 : i32
    %c0_i32_1 = arith.constant 0 : i32
    return %arg0, %c0_i32, %c0_i32_0 : i32, i32, i32
  }
  func.func @transform_7(%arg0: i32) -> (i32, i32, i32) {
    %c0_i32 = arith.constant 0 : i32
    %c0_i32_0 = arith.constant 0 : i32
    %c0_i32_1 = arith.constant 0 : i32
    %c0_i32_2 = arith.constant 0 : i32
    return %c0_i32, %c0_i32_0, %c0_i32_1 : i32, i32, i32
  }
}

</mosaic_0001>

<bundles_post_ra>
// kernel: radar_rnn2_forward.1
= control target key start
LH: loop header
LB: loop body
LE: loop exit
PB: predicated region body
PF: predicated region fallthrough
CT: control target
= control target key end

     0   :  { %s2192_s0 = inlined_call_operand.vmem [shape: f32[8,2,32], index: 0, kind: input, shape index: {}]   ;;  %s2193_s1 = inlined_call_operand.vmem [shape: f32[4,2,32], index: 1, kind: input, shape index: {}]   ;;  %s2194_s2 = inlined_call_operand.vmem [shape: f32[4,64,32], index: 2, kind: input, shape index: {}]   ;;  %s2195_s3 = inlined_call_operand.vmem [shape: f32[4,1,32], index: 3, kind: input, shape index: {}]   ;;  %s2196_s4 = inlined_call_operand.vmem [shape: f32[1,32], index: 4, kind: input, shape index: {}]   ;;  %s2197_s5 = inlined_call_operand.<no memory space> [shape: f32[1,1], index: 5, kind: input, shape index: {}]   ;;  %s2198_s6 = inlined_call_operand.hbm [shape: f32[1,2,8], index: 6, kind: output, shape index: {0}]   ;;  %s2199_s7 = inlined_call_operand.hbm [shape: f32[4,2,32], index: 7, kind: output, shape index: {1}]  }
   0x1   :  { %v13_v0 = vstv %s2197_s5 }
   0x2   :  { %14 = vst [vmem:[#allocation3] sm:$0x1] %v13_v0 }
   0x3   :  { %15 = vsyncpa [#allocation5], 0  ;;  %v33_v1 = vld [vmem:[%s2193_s1] sm:$0x3]  ;;  %vm37_vm0 = vcmask 254976   ;;  %v1527_v2 = vld [vmem:[%s2194_s2 + $0x38] sm:$0xff] }
   0x4   :  { %v1532_v3 = vld [vmem:[%s2194_s2 + $0x30] sm:$0xff]  ;;  %38 = vst.msk [vmem:[#allocation2] sm:$0x3] %vm37_vm0, %v33_v1  ;;  %133 = vmatpush.msra.mxu0 %v1527_v2  ;;  %v1539_v4 = vld [vmem:[%s2194_s2 + $0x28] sm:$0xff]  ;;  %v1544_v5 = vld [vmem:[%s2194_s2 + $0x20] sm:$0xff] }
   0x6   :  { %134 = vmatpush.msra.mxu0 %v1532_v3 }
   0x7   :  { %16 = vsyncpa [#allocation7], 0  ;;  %v1551_v6 = vld [vmem:[%s2194_s2 + $0x18] sm:$0xff]  ;;  %v1557_v8 = vld [vmem:[%s2194_s2 + $0x10] sm:$0xff]  ;;  %s1473_s16 = smov 32   ;;  %vm119_vm1 = vcmask 261120  }
   0x8   :  { %135 = vmatpush.msra.mxu0 %v1539_v4  ;;  %v1564_v9 = vld [vmem:[%s2194_s2 + $0x8] sm:$0xff]  ;;  %v1571_v10 = vld [vmem:[%s2194_s2] sm:$0xff]  ;;  %v1580_v12 = vld [vmem:[%s2194_s2 + $0x78] sm:$0xff]  ;;  %vm121_vm2 = vcmask 523264   ;;  %s1260_s30 = sshll.u32 %s2199_s7, 4  ;;  %s1476_s8 = smov 2   ;;  %s1261_s30 = int_to_ptr.hbm [resolvable:$true] %s1260_s30 }
   0x9   :  { %v34_v11 = vld [vmem:[%s2193_s1 + $0x2] sm:$0x3]  ;;  %v1585_v13 = vld [vmem:[%s2194_s2 + $0x70] sm:$0xff]  ;;  %162 = vmatpush.msra.mxu1 %v1580_v12  ;;  %v114_v15 = vld [vmem:[%s2192_s0] sm:$0x3]  ;;  %s1477_s7 = smov [#allocation4]  }
   0xa   :  { %136 = vmatpush.msra.mxu0 %v1544_v5  ;;  %39 = vst.msk [vmem:[#allocation2 + $0x2] sm:$0x3] %vm37_vm0, %v34_v11  ;;  %v1615_v18 = vld [vmem:[%s2194_s2 + $0x68] sm:$0xff]  ;;  %v1621_v19 = vld [vmem:[%s2194_s2 + $0x60] sm:$0xff]  ;;  %v1627_v20 = vld [vmem:[%s2194_s2 + $0x58] sm:$0xff]  ;;  %s1250_s10 = sshll.u32 %s2198_s6, 4  ;;  %s1251_s10 = int_to_ptr.hbm [resolvable:$true] %s1250_s10 }
   0xb   :  { %v107_v7 = vld [vmem:[#allocation2] sm:$0x3]  ;;  %163 = vmatpush.msra.mxu1 %v1585_v13  ;;  %v1632_v21 = vld [vmem:[%s2194_s2 + $0x50] sm:$0xff]  ;;  %v1638_v22 = vld [vmem:[%s2194_s2 + $0x48] sm:$0xff]  ;;  %vm1227_vm11 = vcmask 58368  }
   0xc   :  { %116 = vrot.lane.b32.xlu0 %v107_v7, %s1473_s16  ;;  %137 = vmatpush.msra.mxu0 %v1551_v6  ;;  %v1644_v23 = vld [vmem:[%s2194_s2 + $0x40] sm:$0xff]  ;;  %v1681_v32 = vld [vmem:[%s2194_s2 + $0xb8] sm:$0xff]  ;;  %v1686_v33 = vld [vmem:[%s2194_s2 + $0xb0] sm:$0xff] }
   0xd   :  { %164 = vmatpush.msra.mxu1 %v1615_v18  ;;  %v35_v24 = vld [vmem:[%s2193_s1 + $0x4] sm:$0x3]  ;;  %v1663_v25 = vld [vmem:[%s2195_s3] ss:$0 sm:$0xff]  ;;  %191 = vmatpush.msra.mxu2 %v1681_v32  ;;  %v1693_v34 = vld [vmem:[%s2194_s2 + $0xa8] sm:$0xff] }
   0xe   :  { %138 = vmatpush.msra.mxu0 %v1557_v8  ;;  %40 = vst.msk [vmem:[#allocation2 + $0x4] sm:$0x3] %vm37_vm0, %v35_v24  ;;  %v1699_v35 = vld [vmem:[%s2194_s2 + $0xa0] sm:$0xff]  ;;  %v1705_v36 = vld [vmem:[%s2194_s2 + $0x98] sm:$0xff]  ;;  %v1710_v37 = vld [vmem:[%s2194_s2 + $0x90] sm:$0xff] }
   0xf   :  { %165 = vmatpush.msra.mxu1 %v1621_v19  ;;  %192 = vmatpush.msra.mxu2 %v1686_v33  ;;  %v1716_v38 = vld [vmem:[%s2194_s2 + $0x88] sm:$0xff]  ;;  %v1722_v39 = vld [vmem:[%s2194_s2 + $0x80] sm:$0xff]  ;;  %v1772_v51 = vld [vmem:[%s2194_s2 + $0xf8] sm:$0xff] }
  0x10   :  { %139 = vmatpush.msra.mxu0 %v1564_v9  ;;  %v36_v40 = vld [vmem:[%s2193_s1 + $0x6] sm:$0x3]  ;;  %v1308_v41 = vld [vmem:[%s2192_s0 + $0x2] sm:$0x3]  ;;  %v1750_v45 = vld [vmem:[%s2195_s3 + $0x1] ss:$0 sm:$0xff]  ;;  %220 = vmatpush.msra.mxu3 %v1772_v51 }
  0x11   :  { %v109_v14 = vld [vmem:[#allocation2 + $0x2] sm:$0x3]  ;;  %166 = vmatpush.msra.mxu1 %v1627_v20  ;;  %193 = vmatpush.msra.mxu2 %v1693_v34  ;;  %41 = vst.msk [vmem:[#allocation2 + $0x6] sm:$0x3] %vm37_vm0, %v36_v40  ;;  %v1777_v52 = vld [vmem:[%s2194_s2 + $0xf0] sm:$0xff]  ;;  %v1784_v53 = vld [vmem:[%s2194_s2 + $0xe8] sm:$0xff] }
  0x12   :  { %140 = vmatpush.msra.mxu0 %v1571_v10  ;;  %221 = vmatpush.msra.mxu3 %v1777_v52  ;;  %v1790_v54 = vld [vmem:[%s2194_s2 + $0xe0] sm:$0xff]  ;;  %v1796_v55 = vld [vmem:[%s2194_s2 + $0xd8] sm:$0xff]  ;;  %v1801_v56 = vld [vmem:[%s2194_s2 + $0xd0] sm:$0xff] }
  0x13   :  { %167 = vmatpush.msra.mxu1 %v1632_v21  ;;  %194 = vmatpush.msra.mxu2 %v1699_v35  ;;  %v1807_v58 = vld [vmem:[%s2194_s2 + $0xc8] sm:$0xff]  ;;  %v1814_v60 = vld [vmem:[%s2194_s2 + $0xc0] sm:$0xff] }
  0x14   :  { %272 = vmatpush.msrb.mxu0 %v1527_v2  ;;  %147 = vrot.lane.b32.xlu0 %v109_v14, %s1473_s16  ;;  %v1838_v0 = vld [vmem:[%s2195_s3 + $0x2] ss:$0 sm:$0xff] }
  0x15   :  { %168 = vmatpush.msra.mxu1 %v1638_v22  ;;  %v111_v31 = vld [vmem:[#allocation2 + $0x4] sm:$0x3]  ;;  %195 = vmatpush.msra.mxu2 %v1705_v36 }
  0x16   :  { %273 = vmatpush.msrb.mxu0 %v1532_v3  ;;  %222 = vmatpush.msra.mxu3 %v1784_v53 }
  0x17   :  { %169 = vmatpush.msra.mxu1 %v1644_v23  ;;  %196 = vmatpush.msra.mxu2 %v1710_v37 }
  0x18   :  { %274 = vmatpush.msrb.mxu0 %v1539_v4  ;;  %v113_v42 = vld [vmem:[#allocation2 + $0x6] sm:$0x3]  ;;  %223 = vmatpush.msra.mxu3 %v1790_v54 }
  0x19   :  { %301 = vmatpush.msrb.mxu1 %v1580_v12  ;;  %197 = vmatpush.msra.mxu2 %v1716_v38 }
  0x1a   :  { %275 = vmatpush.msrb.mxu0 %v1544_v5  ;;  %224 = vmatpush.msra.mxu3 %v1796_v55 }
  0x1b   :  { %302 = vmatpush.msrb.mxu1 %v1585_v13  ;;  %198 = vmatpush.msra.mxu2 %v1722_v39 }
  0x1c   :  { %276 = vmatpush.msrb.mxu0 %v1551_v6  ;;  %205 = vrot.lane.b32.xlu0 %v113_v42, %s1473_s16 }
  0x1d   :  { %303 = vmatpush.msrb.mxu1 %v1615_v18  ;;  %330 = vmatpush.msrb.mxu2 %v1681_v32 }
  0x1e   :  { %277 = vmatpush.msrb.mxu0 %v1557_v8  ;;  %225 = vmatpush.msra.mxu3 %v1801_v56 }
  0x1f   :  { %304 = vmatpush.msrb.mxu1 %v1621_v19  ;;  %331 = vmatpush.msrb.mxu2 %v1686_v33 }
  0x20   :  { %278 = vmatpush.msrb.mxu0 %v1564_v9  ;;  %226 = vmatpush.msra.mxu3 %v1807_v58 }
  0x21   :  { %305 = vmatpush.msrb.mxu1 %v1627_v20  ;;  %332 = vmatpush.msrb.mxu2 %v1693_v34 }
  0x22   :  { %279 = vmatpush.msrb.mxu0 %v1571_v10  ;;  %227 = vmatpush.msra.mxu3 %v1814_v60 }
  0x23   :  { %306 = vmatpush.msrb.mxu1 %v1632_v21  ;;  %333 = vmatpush.msrb.mxu2 %v1699_v35 }
  0x24   :  { %359 = vmatpush.msrb.mxu3 %v1772_v51 }
  0x25   :  { %307 = vmatpush.msrb.mxu1 %v1638_v22  ;;  %334 = vmatpush.msrb.mxu2 %v1705_v36 }
  0x26   :  { %360 = vmatpush.msrb.mxu3 %v1777_v52 }
  0x27   :  { %308 = vmatpush.msrb.mxu1 %v1644_v23  ;;  %335 = vmatpush.msrb.mxu2 %v1710_v37 }
  0x28   :  { %361 = vmatpush.msrb.mxu3 %v1784_v53 }
  0x29   :  { %336 = vmatpush.msrb.mxu2 %v1716_v38 }
  0x2a   :  { %362 = vmatpush.msrb.mxu3 %v1790_v54 }
  0x2b   :  { %337 = vmatpush.msrb.mxu2 %v1722_v39 }
  0x2c   :  { %363 = vmatpush.msrb.mxu3 %v1796_v55 }
  0x2e   :  { %364 = vmatpush.msrb.mxu3 %v1801_v56 }
  0x30   :  { %365 = vmatpush.msrb.mxu3 %v1807_v58 }
  0x32   :  { %366 = vmatpush.msrb.mxu3 %v1814_v60 }
  0x7e   :  { %v117_v16 = vpop.permute.xlu0 %116 }
  0x7f   :  { %v120_v17 = vsel %vm119_vm1, %v114_v15, %v117_v16  ;;  %v1313_v16 = vld [vmem:[%s2192_s0 + $0x4] sm:$0x3] }
  0x80   :  { %1304 = vmatmul.msk.f32.vlgmr.msra.gmra.mxu0 %vm121_vm2, %v120_v17 }
  0x81   :  { %411 = vmatpush.msra.mxu0 %v1527_v2 }
  0x83   :  { %412 = vmatpush.msra.mxu0 %v1532_v3 }
  0x85   :  { %413 = vmatpush.msra.mxu0 %v1539_v4 }
  0x86   :  { %v148_v28 = vpop.permute.xlu0 %147 }
  0x87   :  { %414 = vmatpush.msra.mxu0 %v1544_v5 }
  0x89   :  { %415 = vmatpush.msra.mxu0 %v1551_v6 }
  0x8b   :  { %416 = vmatpush.msra.mxu0 %v1557_v8 }
  0x8d   :  { %417 = vmatpush.msra.mxu0 %v1564_v9 }
  0x8e   :  { %v206_v11 = vpop.permute.xlu0 %205 }
  0x8f   :  { %418 = vmatpush.msra.mxu0 %v1571_v10 }
  0xfd   :  { %v142_v26 = vpop.f32.mrf.mxu0 }
  0xfe   :  { %v143_v27 = vadd.f32 %v1663_v25, %v142_v26 }
 0x100   :  { %1357 = vtanh.f32 %v143_v27 }
 0x106   :  { %v1358_v29 = vpop.eup %1357 }
 0x107   :  { %257 = vrot.lane.b32.xlu1 %v1358_v29, %s1473_s16  ;;  %v150_v30 = vsel %vm119_vm1, %v1358_v29, %v148_v28 }
 0x108   :  { %1305 = vmatmul.msk.f32.vlgmr.msra.gmra.mxu1 %vm121_vm2, %v150_v30 }
 0x109   :  { %440 = vmatpush.msra.mxu1 %v1580_v12 }
 0x10b   :  { %441 = vmatpush.msra.mxu1 %v1585_v13 }
 0x10d   :  { %442 = vmatpush.msra.mxu1 %v1615_v18 }
 0x10f   :  { %176 = vrot.lane.b32.xlu1 %v111_v31, %s1473_s16  ;;  %443 = vmatpush.msra.mxu1 %v1621_v19  ;;  %v1880_v31 = vld [vmem:[%s2195_s3 + $0x3] ss:$0 sm:$0xff] }
 0x111   :  { %444 = vmatpush.msra.mxu1 %v1627_v20 }
 0x113   :  { %445 = vmatpush.msra.mxu1 %v1632_v21 }
 0x115   :  { %446 = vmatpush.msra.mxu1 %v1638_v22 }
 0x117   :  { %447 = vmatpush.msra.mxu1 %v1644_v23 }
 0x179   :  { %v258_v43 = vpop.permute.xlu1 %257 }
 0x17a   :  { %v260_v44 = vsel %vm119_vm1, %v1308_v41, %v258_v43 }
 0x17b   :  { %1309 = vmatmul.msk.f32.vlgmr.msrb.gmra.mxu0 %vm121_vm2, %v260_v44 }
 0x17c   :  { %550 = vmatpush.msrb.mxu0 %v1527_v2 }
 0x17e   :  { %551 = vmatpush.msrb.mxu0 %v1532_v3 }
 0x180   :  { %552 = vmatpush.msrb.mxu0 %v1539_v4 }
 0x181   :  { %v177_v48 = vpop.permute.xlu1 %176 }
 0x182   :  { %553 = vmatpush.msrb.mxu0 %v1544_v5 }
 0x184   :  { %554 = vmatpush.msrb.mxu0 %v1551_v6 }
 0x185   :  { %v171_v46 = vpop.f32.mrf.mxu1 }
 0x186   :  { %v172_v47 = vadd.f32 %v1750_v45, %v171_v46  ;;  %555 = vmatpush.msrb.mxu0 %v1557_v8 }
 0x188   :  { %1359 = vtanh.f32 %v172_v47  ;;  %556 = vmatpush.msrb.mxu0 %v1564_v9 }
 0x18a   :  { %557 = vmatpush.msrb.mxu0 %v1571_v10 }
 0x18e   :  { %v1360_v49 = vpop.eup %1359 }
 0x18f   :  { %286 = vrot.lane.b32.xlu2 %v1360_v49, %s1473_s16  ;;  %v179_v50 = vsel %vm119_vm1, %v1360_v49, %v177_v48 }
 0x190   :  { %1306 = vmatmul.msk.f32.vlgmr.msra.gmra.mxu2 %vm121_vm2, %v179_v50 }
 0x191   :  { %469 = vmatpush.msra.mxu2 %v1681_v32 }
 0x193   :  { %470 = vmatpush.msra.mxu2 %v1686_v33 }
 0x195   :  { %471 = vmatpush.msra.mxu2 %v1693_v34 }
 0x197   :  { %472 = vmatpush.msra.mxu2 %v1699_v35 }
 0x199   :  { %473 = vmatpush.msra.mxu2 %v1705_v36 }
 0x19b   :  { %474 = vmatpush.msra.mxu2 %v1710_v37 }
 0x19d   :  { %475 = vmatpush.msra.mxu2 %v1716_v38 }
 0x19f   :  { %476 = vmatpush.msra.mxu2 %v1722_v39 }
 0x1e9   :  { %v287_v62 = vpop.permute.xlu2 %286 }
 0x1f8   :  { %v281_v57 = vpop.f32.mrf.mxu0 }
 0x1f9   :  { %v282_v59 = vadd.f32 %v1663_v25, %v281_v57 }
 0x1fb   :  { %1361 = vtanh.f32 %v282_v59 }
 0x201   :  { %v1362_v61 = vpop.eup %1361 }
 0x202   :  { %396 = vrot.lane.b32.xlu2 %v1362_v61, %s1473_s16  ;;  %v289_v63 = vsel %vm119_vm1, %v1362_v61, %v287_v62  ;;  %v1318_v62 = vld [vmem:[%s2192_s0 + $0x6] sm:$0x3] }
 0x203   :  { %1310 = vmatmul.msk.f32.vlgmr.msrb.gmra.mxu1 %vm121_vm2, %v289_v63 }
 0x204   :  { %579 = vmatpush.msrb.mxu1 %v1580_v12 }
 0x206   :  { %580 = vmatpush.msrb.mxu1 %v1585_v13 }
 0x208   :  { %581 = vmatpush.msrb.mxu1 %v1615_v18 }
 0x20a   :  { %582 = vmatpush.msrb.mxu1 %v1621_v19 }
 0x20c   :  { %583 = vmatpush.msrb.mxu1 %v1627_v20 }
 0x20e   :  { %584 = vmatpush.msrb.mxu1 %v1632_v21 }
 0x210   :  { %585 = vmatpush.msrb.mxu1 %v1638_v22 }
 0x212   :  { %586 = vmatpush.msrb.mxu1 %v1644_v23 }
 0x213   :  { %v200_v1 = vpop.f32.mrf.mxu2 }
 0x214   :  { %v201_v7 = vadd.f32 %v1838_v0, %v200_v1 }
 0x216   :  { %1363 = vtanh.f32 %v201_v7 }
 0x21c   :  { %v1364_v14 = vpop.eup %1363 }
 0x21d   :  { %315 = vrot.lane.b32.xlu1 %v1364_v14, %s1473_s16  ;;  %v208_v15 = vsel %vm119_vm1, %v1364_v14, %v206_v11 }
 0x21e   :  { %1307 = vmatmul.msk.f32.vlgmr.msra.gmra.mxu3 %vm121_vm2, %v208_v15 }
 0x21f   :  { %498 = vmatpush.msra.mxu3 %v1772_v51 }
 0x221   :  { %499 = vmatpush.msra.mxu3 %v1777_v52 }
 0x223   :  { %500 = vmatpush.msra.mxu3 %v1784_v53 }
 0x225   :  { %501 = vmatpush.msra.mxu3 %v1790_v54 }
 0x227   :  { %502 = vmatpush.msra.mxu3 %v1796_v55 }
 0x229   :  { %503 = vmatpush.msra.mxu3 %v1801_v56 }
 0x22b   :  { %504 = vmatpush.msra.mxu3 %v1807_v58 }
 0x22d   :  { %505 = vmatpush.msra.mxu3 %v1814_v60 }
 0x25c   :  { %v397_v17 = vpop.permute.xlu2 %396 }
 0x25d   :  { %v399_v24 = vsel %vm119_vm1, %v1313_v16, %v397_v17 }
 0x25e   :  { %1314 = vmatmul.msk.f32.vlgmr.msra.gmra.mxu0 %vm121_vm2, %v399_v24 }
 0x25f   :  { %689 = vmatpush.msra.mxu0 %v1527_v2 }
 0x261   :  { %690 = vmatpush.msra.mxu0 %v1532_v3 }
 0x263   :  { %691 = vmatpush.msra.mxu0 %v1539_v4 }
 0x265   :  { %692 = vmatpush.msra.mxu0 %v1544_v5 }
 0x267   :  { %693 = vmatpush.msra.mxu0 %v1551_v6 }
 0x269   :  { %694 = vmatpush.msra.mxu0 %v1557_v8 }
 0x26b   :  { %695 = vmatpush.msra.mxu0 %v1564_v9 }
 0x26d   :  { %696 = vmatpush.msra.mxu0 %v1571_v10 }
 0x280   :  { %v310_v26 = vpop.f32.mrf.mxu1 }
 0x281   :  { %v311_v27 = vadd.f32 %v1750_v45, %v310_v26 }
 0x283   :  { %1365 = vtanh.f32 %v311_v27 }
 0x289   :  { %v1366_v28 = vpop.eup %1365 }
 0x28a   :  { %425 = vrot.lane.b32.xlu2 %v1366_v28, %s1473_s16 }
 0x28f   :  { %v316_v29 = vpop.permute.xlu1 %315 }
 0x290   :  { %v318_v30 = vsel %vm119_vm1, %v1366_v28, %v316_v29 }
 0x291   :  { %1311 = vmatmul.msk.f32.vlgmr.msrb.gmra.mxu2 %vm121_vm2, %v318_v30 }
 0x292   :  { %608 = vmatpush.msrb.mxu2 %v1681_v32 }
 0x294   :  { %609 = vmatpush.msrb.mxu2 %v1686_v33 }
 0x296   :  { %610 = vmatpush.msrb.mxu2 %v1693_v34 }
 0x298   :  { %611 = vmatpush.msrb.mxu2 %v1699_v35 }
 0x29a   :  { %612 = vmatpush.msrb.mxu2 %v1705_v36 }
 0x29c   :  { %613 = vmatpush.msrb.mxu2 %v1710_v37 }
 0x29e   :  { %614 = vmatpush.msrb.mxu2 %v1716_v38 }
 0x2a0   :  { %615 = vmatpush.msrb.mxu2 %v1722_v39 }
 0x2a1   :  { %v229_v40 = vpop.f32.mrf.mxu3 }
 0x2a2   :  { %v230_v41 = vadd.f32 %v1880_v31, %v229_v40 }
 0x2a4   :  { %1367 = vtanh.f32 %v230_v41 }
 0x2aa   :  { %v1885_v42 = vpop.eup %1367 }
 0x2ab   :  { %344 = vrot.lane.b32.xlu1 %v1885_v42, %s1473_s16 }
 0x2db   :  { %v420_v43 = vpop.f32.mrf.mxu0 }
 0x2dc   :  { %v421_v44 = vadd.f32 %v1663_v25, %v420_v43 }
 0x2de   :  { %1369 = vtanh.f32 %v421_v44 }
 0x2e4   :  { %v1370_v46 = vpop.eup %1369  ;;  %v426_v47 = vpop.permute.xlu2 %425 }
 0x2e5   :  { %v428_v48 = vsel %vm119_vm1, %v1370_v46, %v426_v47  ;;  %535 = vrot.lane.b32.xlu0 %v1370_v46, %s1473_s16 }
 0x2e6   :  { %1315 = vmatmul.msk.f32.vlgmr.msra.gmra.mxu1 %vm121_vm2, %v428_v48  ;;  %v1323_v48 = vld [vmem:[%s2192_s0 + $0x8] sm:$0x3] }
 0x2e7   :  { %718 = vmatpush.msra.mxu1 %v1580_v12 }
 0x2e9   :  { %719 = vmatpush.msra.mxu1 %v1585_v13 }
 0x2eb   :  { %720 = vmatpush.msra.mxu1 %v1615_v18 }
 0x2ed   :  { %721 = vmatpush.msra.mxu1 %v1621_v19 }
 0x2ef   :  { %722 = vmatpush.msra.mxu1 %v1627_v20 }
 0x2f1   :  { %723 = vmatpush.msra.mxu1 %v1632_v21 }
 0x2f3   :  { %724 = vmatpush.msra.mxu1 %v1638_v22 }
 0x2f5   :  { %725 = vmatpush.msra.mxu1 %v1644_v23 }
 0x314   :  { %v339_v49 = vpop.f32.mrf.mxu2 }
 0x315   :  { %v340_v50 = vadd.f32 %v1838_v0, %v339_v49 }
 0x317   :  { %1371 = vtanh.f32 %v340_v50 }
 0x31d   :  { %v1372_v57 = vpop.eup %1371  ;;  %v345_v59 = vpop.permute.xlu1 %344 }
 0x31e   :  { %v347_v61 = vsel %vm119_vm1, %v1372_v57, %v345_v59  ;;  %454 = vrot.lane.b32.xlu2 %v1372_v57, %s1473_s16 }
 0x31f   :  { %1312 = vmatmul.msk.f32.vlgmr.msrb.gmra.mxu3 %vm121_vm2, %v347_v61 }
 0x320   :  { %637 = vmatpush.msrb.mxu3 %v1772_v51 }
 0x322   :  { %638 = vmatpush.msrb.mxu3 %v1777_v52 }
 0x324   :  { %639 = vmatpush.msrb.mxu3 %v1784_v53 }
 0x326   :  { %640 = vmatpush.msrb.mxu3 %v1790_v54 }
 0x328   :  { %641 = vmatpush.msrb.mxu3 %v1796_v55 }
 0x32a   :  { %642 = vmatpush.msrb.mxu3 %v1801_v56 }
 0x32c   :  { %643 = vmatpush.msrb.mxu3 %v1807_v58 }
 0x32e   :  { %644 = vmatpush.msrb.mxu3 %v1814_v60 }
 0x357   :  { %v536_v63 = vpop.permute.xlu0 %535 }
 0x358   :  { %v538_v1 = vsel %vm119_vm1, %v1318_v62, %v536_v63 }
 0x359   :  { %1319 = vmatmul.msk.f32.vlgmr.msrb.gmra.mxu0 %vm121_vm2, %v538_v1 }
 0x35a   :  { %828 = vmatpush.msrb.mxu0 %v1527_v2 }
 0x35c   :  { %829 = vmatpush.msrb.mxu0 %v1532_v3 }
 0x35e   :  { %830 = vmatpush.msrb.mxu0 %v1539_v4 }
 0x360   :  { %831 = vmatpush.msrb.mxu0 %v1544_v5 }
 0x362   :  { %832 = vmatpush.msrb.mxu0 %v1551_v6 }
 0x363   :  { %v449_v7 = vpop.f32.mrf.mxu1 }
 0x364   :  { %v450_v11 = vadd.f32 %v1750_v45, %v449_v7  ;;  %833 = vmatpush.msrb.mxu0 %v1557_v8 }
 0x366   :  { %1373 = vtanh.f32 %v450_v11  ;;  %834 = vmatpush.msrb.mxu0 %v1564_v9 }
 0x368   :  { %835 = vmatpush.msrb.mxu0 %v1571_v10 }
 0x36c   :  { %v1374_v14 = vpop.eup %1373 }
 0x36d   :  { %564 = vrot.lane.b32.xlu0 %v1374_v14, %s1473_s16 }
 0x378   :  { %v455_v15 = vpop.permute.xlu2 %454 }
 0x379   :  { %v457_v16 = vsel %vm119_vm1, %v1374_v14, %v455_v15 }
 0x37a   :  { %1316 = vmatmul.msk.f32.vlgmr.msra.gmra.mxu2 %vm121_vm2, %v457_v16 }
 0x37b   :  { %747 = vmatpush.msra.mxu2 %v1681_v32 }
 0x37d   :  { %748 = vmatpush.msra.mxu2 %v1686_v33 }
 0x37f   :  { %749 = vmatpush.msra.mxu2 %v1693_v34 }
 0x381   :  { %750 = vmatpush.msra.mxu2 %v1699_v35 }
 0x383   :  { %751 = vmatpush.msra.mxu2 %v1705_v36 }
 0x385   :  { %752 = vmatpush.msra.mxu2 %v1710_v37 }
 0x387   :  { %753 = vmatpush.msra.mxu2 %v1716_v38 }
 0x389   :  { %754 = vmatpush.msra.mxu2 %v1722_v39 }
 0x3a2   :  { %v368_v17 = vpop.f32.mrf.mxu3 }
 0x3a3   :  { %v369_v24 = vadd.f32 %v1880_v31, %v368_v17 }
 0x3a5   :  { %1375 = vtanh.f32 %v369_v24 }
 0x3ab   :  { %v1939_v26 = vpop.eup %1375 }
 0x3ac   :  { %483 = vrot.lane.b32.xlu2 %v1939_v26, %s1473_s16 }
 0x3d6   :  { %v559_v27 = vpop.f32.mrf.mxu0 }
 0x3d7   :  { %v560_v28 = vadd.f32 %v1663_v25, %v559_v27 }
 0x3d9   :  { %1377 = vtanh.f32 %v560_v28 }
 0x3df   :  { %v1378_v29 = vpop.eup %1377  ;;  %v565_v30 = vpop.permute.xlu0 %564 }
 0x3e0   :  { %v567_v40 = vsel %vm119_vm1, %v1378_v29, %v565_v30  ;;  %674 = vrot.lane.b32.xlu1 %v1378_v29, %s1473_s16 }
 0x3e1   :  { %1320 = vmatmul.msk.f32.vlgmr.msrb.gmra.mxu1 %vm121_vm2, %v567_v40 }
 0x3e2   :  { %857 = vmatpush.msrb.mxu1 %v1580_v12 }
 0x3e4   :  { %858 = vmatpush.msrb.mxu1 %v1585_v13 }
 0x3e6   :  { %859 = vmatpush.msrb.mxu1 %v1615_v18 }
 0x3e8   :  { %860 = vmatpush.msrb.mxu1 %v1621_v19 }
 0x3ea   :  { %861 = vmatpush.msrb.mxu1 %v1627_v20 }
 0x3ec   :  { %862 = vmatpush.msrb.mxu1 %v1632_v21 }
 0x3ee   :  { %863 = vmatpush.msrb.mxu1 %v1638_v22 }
 0x3f0   :  { %864 = vmatpush.msrb.mxu1 %v1644_v23 }
 0x3fd   :  { %v478_v41 = vpop.f32.mrf.mxu2 }
 0x3fe   :  { %v479_v43 = vadd.f32 %v1838_v0, %v478_v41  ;;  %v1328_v41 = vld [vmem:[%s2192_s0 + $0xa] sm:$0x3] }
 0x400   :  { %1379 = vtanh.f32 %v479_v43 }
 0x406   :  { %v1380_v44 = vpop.eup %1379  ;;  %v484_v46 = vpop.permute.xlu2 %483 }
 0x407   :  { %v486_v47 = vsel %vm119_vm1, %v1380_v44, %v484_v46  ;;  %593 = vrot.lane.b32.xlu0 %v1380_v44, %s1473_s16 }
 0x408   :  { %1317 = vmatmul.msk.f32.vlgmr.msra.gmra.mxu3 %vm121_vm2, %v486_v47 }
 0x409   :  { %776 = vmatpush.msra.mxu3 %v1772_v51 }
 0x40b   :  { %777 = vmatpush.msra.mxu3 %v1777_v52 }
 0x40d   :  { %778 = vmatpush.msra.mxu3 %v1784_v53 }
 0x40f   :  { %779 = vmatpush.msra.mxu3 %v1790_v54 }
 0x411   :  { %780 = vmatpush.msra.mxu3 %v1796_v55 }
 0x413   :  { %781 = vmatpush.msra.mxu3 %v1801_v56 }
 0x415   :  { %782 = vmatpush.msra.mxu3 %v1807_v58 }
 0x417   :  { %783 = vmatpush.msra.mxu3 %v1814_v60 }
 0x452   :  { %v675_v49 = vpop.permute.xlu1 %674 }
 0x453   :  { %v677_v50 = vsel %vm119_vm1, %v1323_v48, %v675_v49 }
 0x454   :  { %1324 = vmatmul.msk.f32.vlgmr.msra.gmra.mxu0 %vm121_vm2, %v677_v50 }
 0x455   :  { %967 = vmatpush.msra.mxu0 %v1527_v2 }
 0x457   :  { %968 = vmatpush.msra.mxu0 %v1532_v3 }
 0x459   :  { %969 = vmatpush.msra.mxu0 %v1539_v4 }
 0x45b   :  { %970 = vmatpush.msra.mxu0 %v1544_v5 }
 0x45d   :  { %971 = vmatpush.msra.mxu0 %v1551_v6 }
 0x45e   :  { %v588_v57 = vpop.f32.mrf.mxu1 }
 0x45f   :  { %v589_v59 = vadd.f32 %v1750_v45, %v588_v57  ;;  %972 = vmatpush.msra.mxu0 %v1557_v8 }
 0x461   :  { %1381 = vtanh.f32 %v589_v59  ;;  %973 = vmatpush.msra.mxu0 %v1564_v9 }
 0x463   :  { %974 = vmatpush.msra.mxu0 %v1571_v10 }
 0x467   :  { %v1382_v61 = vpop.eup %1381 }
 0x468   :  { %703 = vrot.lane.b32.xlu1 %v1382_v61, %s1473_s16 }
 0x479   :  { %v594_v62 = vpop.permute.xlu0 %593 }
 0x47a   :  { %v596_v63 = vsel %vm119_vm1, %v1382_v61, %v594_v62 }
 0x47b   :  { %1321 = vmatmul.msk.f32.vlgmr.msrb.gmra.mxu2 %vm121_vm2, %v596_v63 }
 0x47c   :  { %886 = vmatpush.msrb.mxu2 %v1681_v32 }
 0x47e   :  { %887 = vmatpush.msrb.mxu2 %v1686_v33 }
 0x480   :  { %888 = vmatpush.msrb.mxu2 %v1693_v34 }
 0x482   :  { %889 = vmatpush.msrb.mxu2 %v1699_v35 }
 0x484   :  { %890 = vmatpush.msrb.mxu2 %v1705_v36 }
 0x486   :  { %891 = vmatpush.msrb.mxu2 %v1710_v37 }
 0x488   :  { %892 = vmatpush.msrb.mxu2 %v1716_v38 }
 0x48a   :  { %893 = vmatpush.msrb.mxu2 %v1722_v39 }
 0x48b   :  { %v507_v1 = vpop.f32.mrf.mxu3 }
 0x48c   :  { %v508_v7 = vadd.f32 %v1880_v31, %v507_v1 }
 0x48e   :  { %1383 = vtanh.f32 %v508_v7 }
 0x494   :  { %v1993_v11 = vpop.eup %1383 }
 0x495   :  { %622 = vrot.lane.b32.xlu0 %v1993_v11, %s1473_s16 }
 0x4d1   :  { %v698_v14 = vpop.f32.mrf.mxu0 }
 0x4d2   :  { %v699_v15 = vadd.f32 %v1663_v25, %v698_v14 }
 0x4d4   :  { %1385 = vtanh.f32 %v699_v15 }
 0x4da   :  { %v1386_v16 = vpop.eup %1385  ;;  %v704_v17 = vpop.permute.xlu1 %703 }
 0x4db   :  { %v706_v24 = vsel %vm119_vm1, %v1386_v16, %v704_v17  ;;  %813 = vrot.lane.b32.xlu2 %v1386_v16, %s1473_s16  ;;  %v1338_v17 = vld [vmem:[%s2192_s0 + $0xe] sm:$0x3] }
 0x4dc   :  { %1325 = vmatmul.msk.f32.vlgmr.msra.gmra.mxu1 %vm121_vm2, %v706_v24 }
 0x4dd   :  { %996 = vmatpush.msra.mxu1 %v1580_v12 }
 0x4df   :  { %997 = vmatpush.msra.mxu1 %v1585_v13 }
 0x4e1   :  { %998 = vmatpush.msra.mxu1 %v1615_v18 }
 0x4e3   :  { %999 = vmatpush.msra.mxu1 %v1621_v19 }
 0x4e5   :  { %1000 = vmatpush.msra.mxu1 %v1627_v20 }
 0x4e7   :  { %1001 = vmatpush.msra.mxu1 %v1632_v21 }
 0x4e9   :  { %1002 = vmatpush.msra.mxu1 %v1638_v22 }
 0x4eb   :  { %1003 = vmatpush.msra.mxu1 %v1644_v23 }
 0x4fe   :  { %v617_v27 = vpop.f32.mrf.mxu2 }
 0x4ff   :  { %v618_v28 = vadd.f32 %v1838_v0, %v617_v27 }
 0x501   :  { %1387 = vtanh.f32 %v618_v28  ;;  %v2127_v28 = vld [vmem:[%s2196_s4] ss:$0 sm:$0xff]  ;;  %s1475_s4 = smov [#allocation6]  }
 0x502   :  { %s1258_s27 = sshll.u32 %s1475_s4, 4  ;;  %s1259_s27 = int_to_ptr.vmem [resolvable:$true] %s1258_s27 }
 0x507   :  { %v1388_v29 = vpop.eup %1387  ;;  %v623_v30 = vpop.permute.xlu0 %622 }
 0x508   :  { %v625_v40 = vsel %vm119_vm1, %v1388_v29, %v623_v30  ;;  %732 = vrot.lane.b32.xlu1 %v1388_v29, %s1473_s16  ;;  %v233_v29 = vmul.f32 %v1885_v42, %v2127_v28 }
 0x509   :  { %1322 = vmatmul.msk.f32.vlgmr.msrb.gmra.mxu3 %vm121_vm2, %v625_v40 }
 0x50a   :  { %915 = vmatpush.msrb.mxu3 %v1772_v51  ;;  %v235_v30 = vsel %vm37_vm0, %v233_v29, 0.0 }
 0x50c   :  { %916 = vmatpush.msrb.mxu3 %v1777_v52 }
 0x50e   :  { %917 = vmatpush.msrb.mxu3 %v1784_v53 }
 0x510   :  { %918 = vmatpush.msrb.mxu3 %v1790_v54 }
 0x512   :  { %919 = vmatpush.msrb.mxu3 %v1796_v55 }
 0x514   :  { %920 = vmatpush.msrb.mxu3 %v1801_v56 }
 0x516   :  { %921 = vmatpush.msrb.mxu3 %v1807_v58 }
 0x518   :  { %922 = vmatpush.msrb.mxu3 %v1814_v60 }
 0x535   :  { %v814_v43 = vpop.permute.xlu2 %813 }
 0x536   :  { %v816_v44 = vsel %vm119_vm1, %v1328_v41, %v814_v43 }
 0x537   :  { %1329 = vmatmul.msk.f32.vlgmr.msrb.gmra.mxu0 %vm121_vm2, %v816_v44 }
 0x538   :  { %1106 = vmatpush.msrb.mxu0 %v1527_v2 }
 0x53a   :  { %1107 = vmatpush.msrb.mxu0 %v1532_v3 }
 0x53c   :  { %1108 = vmatpush.msrb.mxu0 %v1539_v4 }
 0x53e   :  { %1109 = vmatpush.msrb.mxu0 %v1544_v5 }
 0x540   :  { %1110 = vmatpush.msrb.mxu0 %v1551_v6 }
 0x542   :  { %1111 = vmatpush.msrb.mxu0 %v1557_v8 }
 0x544   :  { %1112 = vmatpush.msrb.mxu0 %v1564_v9 }
 0x546   :  { %1113 = vmatpush.msrb.mxu0 %v1571_v10 }
 0x559   :  { %v727_v46 = vpop.f32.mrf.mxu1 }
 0x55a   :  { %v728_v47 = vadd.f32 %v1750_v45, %v727_v46 }
 0x55c   :  { %1389 = vtanh.f32 %v728_v47 }
 0x562   :  { %v1390_v48 = vpop.eup %1389 }
 0x563   :  { %842 = vrot.lane.b32.xlu2 %v1390_v48, %s1473_s16 }
 0x57a   :  { %v733_v2 = vpop.permute.xlu1 %732 }
 0x57b   :  { %v735_v3 = vsel %vm119_vm1, %v1390_v48, %v733_v2 }
 0x57c   :  { %1326 = vmatmul.msk.f32.vlgmr.msra.gmra.mxu2 %vm121_vm2, %v735_v3  ;;  %v1474_v3 = vmov 0  }
 0x57d   :  { %1025 = vmatpush.msra.mxu2 %v1681_v32  ;;  %1348 = vset.pattern.permute.xlu0 %v1474_v3 }
 0x57e   :  { %1350 = vset.pattern.permute.xlu1 %v1474_v3  ;;  %1349 = vset.pattern.permute.xlu2 %v1474_v3 }
 0x57f   :  { %1026 = vmatpush.msra.mxu2 %v1686_v33 }
 0x581   :  { %1027 = vmatpush.msra.mxu2 %v1693_v34 }
 0x583   :  { %1028 = vmatpush.msra.mxu2 %v1699_v35 }
 0x585   :  { %1029 = vmatpush.msra.mxu2 %v1705_v36 }
 0x587   :  { %1030 = vmatpush.msra.mxu2 %v1710_v37 }
 0x589   :  { %1031 = vmatpush.msra.mxu2 %v1716_v38 }
 0x58b   :  { %1032 = vmatpush.msra.mxu2 %v1722_v39 }
 0x58c   :  { %v646_v4 = vpop.f32.mrf.mxu3 }
 0x58d   :  { %v647_v5 = vadd.f32 %v1880_v31, %v646_v4  ;;  %v2141_v4 = vld [vmem:[#allocation3] ss:$0 sm:$0xff] }
 0x58f   :  { %1391 = vtanh.f32 %v647_v5 }
 0x595   :  { %v2047_v6 = vpop.eup %1391 }
 0x596   :  { %761 = vrot.lane.b32.xlu1 %v2047_v6, %s1473_s16 }
 0x5b4   :  { %v837_v8 = vpop.f32.mrf.mxu0 }
 0x5b5   :  { %v838_v9 = vadd.f32 %v1663_v25, %v837_v8 }
 0x5b7   :  { %1393 = vtanh.f32 %v838_v9 }
 0x5bd   :  { %v1394_v10 = vpop.eup %1393  ;;  %v843_v49 = vpop.permute.xlu2 %842 }
 0x5be   :  { %v845_v50 = vsel %vm119_vm1, %v1394_v10, %v843_v49  ;;  %952 = vrot.lane.b32.xlu0 %v1394_v10, %s1473_s16 }
 0x5bf   :  { %1330 = vmatmul.msk.f32.vlgmr.msrb.gmra.mxu1 %vm121_vm2, %v845_v50 }
 0x5c0   :  { %1135 = vmatpush.msrb.mxu1 %v1580_v12 }
 0x5c2   :  { %1136 = vmatpush.msrb.mxu1 %v1585_v13 }
 0x5c4   :  { %1137 = vmatpush.msrb.mxu1 %v1615_v18  ;;  %v1333_v18 = vld [vmem:[%s2192_s0 + $0xc] sm:$0x3] }
 0x5c6   :  { %1138 = vmatpush.msrb.mxu1 %v1621_v19 }
 0x5c8   :  { %1139 = vmatpush.msrb.mxu1 %v1627_v20 }
 0x5ca   :  { %1140 = vmatpush.msrb.mxu1 %v1632_v21 }
 0x5cc   :  { %1141 = vmatpush.msrb.mxu1 %v1638_v22 }
 0x5ce   :  { %1142 = vmatpush.msrb.mxu1 %v1644_v23 }
 0x5ff   :  { %v756_v57 = vpop.f32.mrf.mxu2 }
 0x600   :  { %v757_v59 = vadd.f32 %v1838_v0, %v756_v57 }
 0x602   :  { %1395 = vtanh.f32 %v757_v59 }
 0x608   :  { %v1396_v61 = vpop.eup %1395  ;;  %v762_v12 = vpop.permute.xlu1 %761 }
 0x609   :  { %v764_v13 = vsel %vm119_vm1, %v1396_v61, %v762_v12  ;;  %871 = vrot.lane.b32.xlu2 %v1396_v61, %s1473_s16 }
 0x60a   :  { %1327 = vmatmul.msk.f32.vlgmr.msra.gmra.mxu3 %vm121_vm2, %v764_v13 }
 0x60b   :  { %1054 = vmatpush.msra.mxu3 %v1772_v51 }
 0x60d   :  { %1055 = vmatpush.msra.mxu3 %v1777_v52 }
 0x60f   :  { %1056 = vmatpush.msra.mxu3 %v1784_v53 }
 0x611   :  { %1057 = vmatpush.msra.mxu3 %v1790_v54 }
 0x613   :  { %1058 = vmatpush.msra.mxu3 %v1796_v55 }
 0x615   :  { %1059 = vmatpush.msra.mxu3 %v1801_v56 }
 0x617   :  { %1060 = vmatpush.msra.mxu3 %v1807_v58 }
 0x619   :  { %1061 = vmatpush.msra.mxu3 %v1814_v60 }
 0x630   :  { %v953_v19 = vpop.permute.xlu0 %952 }
 0x631   :  { %v955_v20 = vsel %vm119_vm1, %v1333_v18, %v953_v19  ;;  %v650_v18 = vmul.f32 %v2047_v6, %v2127_v28 }
 0x632   :  { %1334 = vmatmul.msk.f32.vlgmr.msra.gmra.mxu0 %vm121_vm2, %v955_v20 }
 0x633   :  { %v651_v19 = vsel %vm37_vm0, %v650_v18, 0.0 }
 0x63c   :  { %v866_v21 = vpop.f32.mrf.mxu1 }
 0x63d   :  { %v867_v22 = vadd.f32 %v1750_v45, %v866_v21 }
 0x63f   :  { %1397 = vtanh.f32 %v867_v22 }
 0x645   :  { %v1398_v23 = vpop.eup %1397 }
 0x646   :  { %981 = vrot.lane.b32.xlu0 %v1398_v23, %s1473_s16 }
 0x663   :  { %v872_v62 = vpop.permute.xlu2 %871 }
 0x664   :  { %v874_v63 = vsel %vm119_vm1, %v1398_v23, %v872_v62 }
 0x665   :  { %1331 = vmatmul.msk.f32.vlgmr.msrb.gmra.mxu2 %vm121_vm2, %v874_v63 }
 0x666   :  { %1164 = vmatpush.msrb.mxu2 %v1681_v32 }
 0x668   :  { %1165 = vmatpush.msrb.mxu2 %v1686_v33 }
 0x66a   :  { %1166 = vmatpush.msrb.mxu2 %v1693_v34 }
 0x66c   :  { %1167 = vmatpush.msrb.mxu2 %v1699_v35 }
 0x66e   :  { %1168 = vmatpush.msrb.mxu2 %v1705_v36 }
 0x670   :  { %1169 = vmatpush.msrb.mxu2 %v1710_v37 }
 0x672   :  { %1170 = vmatpush.msrb.mxu2 %v1716_v38 }
 0x674   :  { %1171 = vmatpush.msrb.mxu2 %v1722_v39 }
 0x68d   :  { %v785_v1 = vpop.f32.mrf.mxu3 }
 0x68e   :  { %v786_v7 = vadd.f32 %v1880_v31, %v785_v1 }
 0x690   :  { %1399 = vtanh.f32 %v786_v7 }
 0x696   :  { %v2093_v14 = vpop.eup %1399 }
 0x697   :  { %900 = vrot.lane.b32.xlu2 %v2093_v14, %s1473_s16 }
 0x6af   :  { %v976_v32 = vpop.f32.mrf.mxu0 }
 0x6b0   :  { %v977_v33 = vadd.f32 %v1663_v25, %v976_v32 }
 0x6b2   :  { %1401 = vtanh.f32 %v977_v33 }
 0x6b8   :  { %v1402_v34 = vpop.eup %1401  ;;  %v982_v35 = vpop.permute.xlu0 %981 }
 0x6b9   :  { %v984_v36 = vsel %vm119_vm1, %v1402_v34, %v982_v35  ;;  %1091 = vrot.lane.b32.xlu1 %v1402_v34, %s1473_s16 }
 0x6ba   :  { %1335 = vmatmul.msk.f32.vlgmr.msra.gmra.mxu1 %vm121_vm2, %v984_v36 }
 0x6e8   :  { %v895_v37 = vpop.f32.mrf.mxu2 }
 0x6e9   :  { %v896_v38 = vadd.f32 %v1838_v0, %v895_v37 }
 0x6eb   :  { %1403 = vtanh.f32 %v896_v38 }
 0x6f1   :  { %v1404_v39 = vpop.eup %1403  ;;  %v901_v15 = vpop.permute.xlu2 %900 }
 0x6f2   :  { %v903_v16 = vsel %vm119_vm1, %v1404_v39, %v901_v15  ;;  %1010 = vrot.lane.b32.xlu0 %v1404_v39, %s1473_s16 }
 0x6f3   :  { %1332 = vmatmul.msk.f32.vlgmr.msrb.gmra.mxu3 %vm121_vm2, %v903_v16 }
 0x6f4   :  { %1193 = vmatpush.msrb.mxu3 %v1772_v51 }
 0x6f6   :  { %1194 = vmatpush.msrb.mxu3 %v1777_v52 }
 0x6f8   :  { %1195 = vmatpush.msrb.mxu3 %v1784_v53 }
 0x6fa   :  { %1196 = vmatpush.msrb.mxu3 %v1790_v54 }
 0x6fc   :  { %1197 = vmatpush.msrb.mxu3 %v1796_v55 }
 0x6fe   :  { %1198 = vmatpush.msrb.mxu3 %v1801_v56 }
 0x700   :  { %1199 = vmatpush.msrb.mxu3 %v1807_v58 }
 0x702   :  { %1200 = vmatpush.msrb.mxu3 %v1814_v60 }
 0x72b   :  { %v1092_v24 = vpop.permute.xlu1 %1091 }
 0x72c   :  { %v1094_v51 = vsel %vm119_vm1, %v1338_v17, %v1092_v24 }
 0x72d   :  { %1339 = vmatmul.msk.f32.vlgmr.msrb.gmra.mxu0 %vm121_vm2, %v1094_v51  ;;  %v789_v51 = vmul.f32 %v2093_v14, %v2127_v28 }
 0x737   :  { %v1005_v52 = vpop.f32.mrf.mxu1 }
 0x738   :  { %v1006_v53 = vadd.f32 %v1750_v45, %v1005_v52 }
 0x73a   :  { %1405 = vtanh.f32 %v1006_v53 }
 0x740   :  { %v1406_v54 = vpop.eup %1405 }
 0x741   :  { %1120 = vrot.lane.b32.xlu1 %v1406_v54, %s1473_s16 }
 0x764   :  { %v1011_v55 = vpop.permute.xlu0 %1010 }
 0x765   :  { %v1013_v56 = vsel %vm119_vm1, %v1406_v54, %v1011_v55 }
 0x766   :  { %1336 = vmatmul.msk.f32.vlgmr.msra.gmra.mxu2 %vm121_vm2, %v1013_v56 }
 0x776   :  { %v924_v58 = vpop.f32.mrf.mxu3 }
 0x777   :  { %v925_v60 = vadd.f32 %v1880_v31, %v924_v58 }
 0x779   :  { %1407 = vtanh.f32 %v925_v60 }
 0x77f   :  { %v1408_v27 = vpop.eup %1407 }
 0x780   :  { %1039 = vrot.lane.b32.xlu2 %v1408_v27, %s1473_s16  ;;  %v928_v20 = vmul.f32 %v1408_v27, %v2127_v28 }
 0x782   :  { %v929_v21 = vsel %vm37_vm0, %v928_v20, 0.0 }
 0x7a9   :  { %236 = vadd.xlane.f32.xlu2 %v235_v30 }
 0x7aa   :  { %v1115_v40 = vpop.f32.mrf.mxu0 }
 0x7ab   :  { %v1116_v41 = vadd.f32 %v1663_v25, %v1115_v40 }
 0x7ad   :  { %1409 = vtanh.f32 %v1116_v41 }
 0x7b3   :  { %v1410_v43 = vpop.eup %1409  ;;  %v1121_v44 = vpop.permute.xlu1 %1120 }
 0x7b4   :  { %1229 = vst.msk [vmem:[#allocation2] sm:$0x3] %vm37_vm0, %v1410_v43  ;;  %v1123_v46 = vsel %vm119_vm1, %v1410_v43, %v1121_v44 }
 0x7b5   :  { %1236 = vst.msk [vmem:[#allocation6] sm:$0x3] %vm37_vm0, %v1410_v43  ;;  %1340 = vmatmul.msk.f32.vlgmr.msrb.gmra.mxu1 %vm121_vm2, %v1123_v46 }
 0x7da   :  { %v1040_v2 = vpop.permute.xlu2 %1039 }
 0x7e9   :  { %v1034_v47 = vpop.f32.mrf.mxu2 }
 0x7ea   :  { %v1035_v42 = vadd.f32 %v1838_v0, %v1034_v47 }
 0x7ec   :  { %1411 = vtanh.f32 %v1035_v42 }
 0x7f2   :  { %v1412_v48 = vpop.eup %1411 }
 0x7f3   :  { %1149 = vrot.lane.b32.xlu0 %v1412_v48, %s1473_s16  ;;  %v1042_v25 = vsel %vm119_vm1, %v1412_v48, %v1040_v2 }
 0x7f4   :  { %1337 = vmatmul.msk.f32.vlgmr.msra.gmra.mxu3 %vm121_vm2, %v1042_v25 }
 0x81c   :  { %v237_v5 = vpop.xlane.xlu2 %236 }
 0x81d   :  { %v238_v8 = vadd.f32 %v2141_v4, %v237_v5 }
 0x81f   :  { %242 = vperm.xlu0 %1348, %v238_v8  }
 0x832   :  { %v1144_v9 = vpop.f32.mrf.mxu1 }
 0x833   :  { %v1145_v10 = vadd.f32 %v1750_v45, %v1144_v9  ;;  %v372_v45 = vmul.f32 %v1939_v26, %v2127_v28 }
 0x835   :  { %1413 = vtanh.f32 %v1145_v10  ;;  %v373_v13 = vsel %vm37_vm0, %v372_v45, 0.0 }
 0x83b   :  { %v1414_v49 = vpop.eup %1413 }
 0x83c   :  { %1230 = vst.msk [vmem:[#allocation2 + $0x2] sm:$0x3] %vm37_vm0, %v1414_v49 }
 0x83d   :  { %1238 = vst.msk [vmem:[#allocation6 + $0x2] sm:$0x3] %vm37_vm0, %v1414_v49 }
 0x865   :  { %v1150_v50 = vpop.permute.xlu0 %1149 }
 0x866   :  { %v1152_v57 = vsel %vm119_vm1, %v1414_v49, %v1150_v50 }
 0x867   :  { %1341 = vmatmul.msk.f32.vlgmr.msrb.gmra.mxu2 %vm121_vm2, %v1152_v57 }
 0x877   :  { %v1063_v59 = vpop.f32.mrf.mxu3 }
 0x878   :  { %v1064_v61 = vadd.f32 %v1880_v31, %v1063_v59 }
 0x87a   :  { %1415 = vtanh.f32 %v1064_v61 }
 0x880   :  { %v1416_v12 = vpop.eup %1415 }
 0x881   :  { %1178 = vrot.lane.b32.xlu1 %v1416_v12, %s1473_s16  ;;  %v1067_v34 = vmul.f32 %v1416_v12, %v2127_v28 }
 0x883   :  { %v1068_v35 = vsel %vm37_vm0, %v1067_v34, 0.0 }
 0x891   :  { %v243_v39 = vpop.permute.xlu0 %242 }
 0x8ab   :  { %374 = vadd.xlane.f32.xlu1 %v373_v13 }
 0x8b3   :  { %652 = vadd.xlane.f32.xlu1 %v651_v19 }
 0x8bb   :  { %930 = vadd.xlane.f32.xlu1 %v929_v21 }
 0x8ea   :  { %v1173_v22 = vpop.f32.mrf.mxu2 }
 0x8eb   :  { %v1174_v23 = vadd.f32 %v1838_v0, %v1173_v22  ;;  %v511_v0 = vmul.f32 %v1993_v11, %v2127_v28 }
 0x8ed   :  { %1417 = vtanh.f32 %v1174_v23  ;;  %v512_v33 = vsel %vm37_vm0, %v511_v0, 0.0 }
 0x8f3   :  { %v1418_v62 = vpop.eup %1417  ;;  %v1179_v26 = vpop.permute.xlu1 %1178 }
 0x8f4   :  { %1231 = vst.msk [vmem:[#allocation2 + $0x4] sm:$0x3] %vm37_vm0, %v1418_v62  ;;  %v1181_v63 = vsel %vm119_vm1, %v1418_v62, %v1179_v26 }
 0x8f5   :  { %1240 = vst.msk [vmem:[#allocation6 + $0x4] sm:$0x3] %vm37_vm0, %v1418_v62  ;;  %1342 = vmatmul.msk.f32.vlgmr.msrb.gmra.mxu3 %vm121_vm2, %v1181_v63 }
 0x91e   :  { %v375_v6 = vpop.xlane.xlu1 %374 }
 0x91f   :  { %v376_v1 = vadd.f32 %v2141_v4, %v375_v6 }
 0x921   :  { %380 = vperm.xlu0 %1348, %v376_v1  }
 0x926   :  { %v653_v7 = vpop.xlane.xlu1 %652 }
 0x927   :  { %v654_v32 = vadd.f32 %v2141_v4, %v653_v7 }
 0x929   :  { %658 = vperm.xlu1 %1350, %v654_v32  }
 0x92e   :  { %v931_v54 = vpop.xlane.xlu1 %930 }
 0x92f   :  { %v932_v55 = vadd.f32 %v2141_v4, %v931_v54 }
 0x94b   :  { %513 = vadd.xlane.f32.xlu0 %v512_v33 }
 0x953   :  { %1069 = vadd.xlane.f32.xlu0 %v1068_v35 }
 0x978   :  { %v1202_v36 = vpop.f32.mrf.mxu3 }
 0x979   :  { %v1203_v37 = vadd.f32 %v1880_v31, %v1202_v36  ;;  %v790_v31 = vsel %vm37_vm0, %v789_v51, 0.0 }
 0x97b   :  { %1419 = vtanh.f32 %v1203_v37 }
 0x981   :  { %v1420_v38 = vpop.eup %1419 }
 0x982   :  { %1232 = vst.msk [vmem:[#allocation2 + $0x6] sm:$0x3] %vm37_vm0, %v1420_v38  ;;  %v1206_v52 = vmul.f32 %v1420_v38, %v2127_v28  ;;  %v104_v28 = vlaneseq }
 0x983   :  { %1242 = vst.msk [vmem:[#allocation6 + $0x6] sm:$0x3] %vm37_vm0, %v1420_v38 }
 0x984   :  { %v1207_v53 = vsel %vm37_vm0, %v1206_v52, 0.0  ;;  %1266 = dma.vmem_to_hbm [thread:$0]  %s1259_s27, 128, %s1261_s30, [#allocation7], %s1473_s16, %s1473_s16, %s1476_s8   ;;  %v105_v29 = vand.u32 127, %v104_v28 }
 0x985   :  { %s1248_s16 = sshll.u32 %s1477_s7, 4  ;;  %s1249_s16 = int_to_ptr.vmem [resolvable:$true] %s1248_s16 }
 0x986   :  { %vm239_vm3 = vcmp.eq.s32.totalorder %v105_v29, 0  ;;  %vm377_vm4 = vcmp.eq.s32.totalorder %v105_v29, 1  ;;  %vm516_vm5 = vcmp.eq.s32.totalorder %v105_v29, 2  ;;  %vm655_vm6 = vcmp.eq.s32.totalorder %v105_v29, 3 }
 0x987   :  { %v245_v30 = vsel %vm239_vm3, %v243_v39, 0.0  ;;  %vm794_vm7 = vcmp.eq.s32.totalorder %v105_v29, 4  ;;  %vm933_vm8 = vcmp.eq.s32.totalorder %v105_v29, 5  ;;  %vm1072_vm9 = vcmp.eq.s32.totalorder %v105_v29, 6 }
 0x988   :  { %vm1211_vm10 = vcmp.eq.s32.totalorder %v105_v29, 7 }
 0x993   :  { %v381_v15 = vpop.permute.xlu0 %380 }
 0x994   :  { %v383_v40 = vsel %vm377_vm4, %v381_v15, %v245_v30 }
 0x99b   :  { %v659_v43 = vpop.permute.xlu1 %658 }
 0x9be   :  { %v514_v11 = vpop.xlane.xlu0 %513 }
 0x9bf   :  { %v515_v16 = vadd.f32 %v2141_v4, %v514_v11 }
 0x9c1   :  { %519 = vperm.xlu2 %1349, %v515_v16  }
 0x9c6   :  { %v1070_v17 = vpop.xlane.xlu0 %1069 }
 0x9c7   :  { %v1071_v24 = vadd.f32 %v2141_v4, %v1070_v17 }
 0x9c9   :  { %1075 = vperm.xlu1 %1350, %v1071_v24  }
 0x9ea   :  { %791 = vadd.xlane.f32.xlu2 %v790_v31 }
 0x9f2   :  { %1208 = vadd.xlane.f32.xlu2 %v1207_v53 }
 0xa0a   :  { %936 = vperm.xlu2 %1349, %v932_v55  }
 0xa1b   :  { %v520_v56 = vpop.permute.xlu2 %519 }
 0xa1c   :  { %v522_v41 = vsel %vm516_vm5, %v520_v56, %v383_v40 }
 0xa1d   :  { %v661_v46 = vsel %vm655_vm6, %v659_v43, %v522_v41 }
 0xa3b   :  { %v1076_v2 = vpop.permute.xlu1 %1075 }
 0xa5d   :  { %v792_v58 = vpop.xlane.xlu2 %791 }
 0xa5e   :  { %v793_v60 = vadd.f32 %v2141_v4, %v792_v58 }
 0xa60   :  { %797 = vperm.xlu0 %1348, %v793_v60  }
 0xa65   :  { %v1209_v14 = vpop.xlane.xlu2 %1208 }
 0xa66   :  { %v1210_v27 = vadd.f32 %v2141_v4, %v1209_v14 }
 0xa68   :  { %1214 = vperm.xlu0 %1348, %v1210_v27  }
 0xa6d   :  { %v937_v42 = vpop.permute.xlu2 %936 }
 0xad2   :  { %v798_v44 = vpop.permute.xlu0 %797 }
 0xad3   :  { %v800_v47 = vsel %vm794_vm7, %v798_v44, %v661_v46 }
 0xad4   :  { %v939_v48 = vsel %vm933_vm8, %v937_v42, %v800_v47 }
 0xad5   :  { %v1078_v25 = vsel %vm1072_vm9, %v1076_v2, %v939_v48 }
 0xada   :  { %v1215_v3 = vpop.permute.xlu0 %1214 }
 0xadb   :  { %v1217_v4 = vsel %vm1211_vm10, %v1215_v3, %v1078_v25 }
 0xadc   :  { %1228 = vst.msk [vmem:[#allocation4] sm:$0x3] %vm1227_vm11, %v1217_v4 }
 0xadd   :  { %1253 = dma.vmem_to_hbm [thread:$0]  %s1249_s16, 32, %s1251_s10, [#allocation5]  }
 0xade   :  { %1469 = dma.done.wait [#allocation5], 32  }
 0xadf   :  { %1470 = vsyncadd [#allocation5], 4294967264 }
 0xae0   :  { %1471 = dma.done.wait [#allocation7], 128  }
 0xae1   :  { %1472 = vsyncadd [#allocation7], 4294967168 }
 0xae2   :  { %1275 = vsyncpa [#allocation5], 1 }
 0xae3   :  { %1276 = vsyncpa [#allocation7], 1 }

</bundles_post_ra>
